<compile_context>
chip_gen: v6e
topology: v6e:2x2x1
jax: 0.10.0
libtpu: 0.0.40
codegen_flags: <defaults>
</compile_context>

<pallas_src>
import jax
import jax.numpy as jnp
import numpy as np
from jax.experimental import pallas as pl
from jax.experimental.pallas import tpu as pltpu


# ---------------------------------------------------------------------------
# Module setup helpers (pure Python / JAX glue)
# ---------------------------------------------------------------------------
def _compute_length_lxlylz(l):
    return int((l + 1) * (l + 2) / 2)


def _init_angular_dim_groups(max_l):
    groups = []
    l_now = 0
    for l in range(max_l + 1):
        groups.append([l_now, l_now + _compute_length_lxlylz(l)])
        l_now += _compute_length_lxlylz(l)
    return groups


def make_group_ids(max_l):
    """int32 array of length A mapping each angular index -> its group index."""
    groups = _init_angular_dim_groups(max_l)
    ids = []
    for g, (s, e) in enumerate(groups):
        ids.extend([g] * (e - s))
    return jnp.asarray(ids, dtype=jnp.int32), len(groups), groups[-1][1]


def init_weights(key, num_groups, radial_dim, radial_embedding_dim):
    """Stand-in for torch.rand([radial_dim, radial_embedding_dim]) per group."""
    # TODO(synk): channel_dim is not None path ('ijkh,jmh->imkh') not implemented here.
    return jax.random.uniform(
        key, (num_groups, radial_dim, radial_embedding_dim), dtype=jnp.float32
    )


# ---------------------------------------------------------------------------
# Pallas kernel
# ---------------------------------------------------------------------------
def _radial_transform_kernel(x_ref, w_ref, o_ref):
    # x_ref: (Nt, R, L)   streamed node block, native layout, input dtype
    # w_ref: (M, R, L)    resident, pre-gathered/broadcast weights (float32)
    # o_ref: (Nt, M, L)
    m_dim, r_dim, _ = w_ref.shape

    # Hoist the per-r slices of x once (upcast to f32 for accumulation).
    xs = [x_ref[:, r, :].astype(jnp.float32) for r in range(r_dim)]

    outs = []
    for m in range(m_dim):
        acc = xs[0] * w_ref[m, 0:1, :]            # (Nt, L) * (1, L)
        for r in range(1, r_dim):
            acc = acc + xs[r] * w_ref[m, r:r + 1, :]
        outs.append(acc)                          # (Nt, L), f32

    # Single full-block, lane/sublane-dense store (no masked per-m stores).
    o_ref[...] = jnp.stack(outs, axis=1).astype(o_ref.dtype)


# ---------------------------------------------------------------------------
# Tiling / VMEM sizing helpers
# ---------------------------------------------------------------------------
def _round_up(v, m):
    return (v + m - 1) // m * m


def _default_vmem_sizes():
    """Generation-aware (budget, limit) in bytes."""
    cap = None
    try:
        info = pltpu.get_tpu_info()
        cap = getattr(info, "vmem_capacity_bytes", None)
    except Exception:
        cap = None
    if not cap or cap <= 0:
        cap = 64 * 1024 * 1024  # conservative fallback (v7x-era per-TC VMEM)
    limit = int(cap * 0.85)     # ~15% headroom for compiler-internal scratch
    budget = int(limit * 0.80)  # extra slack for in-kernel temporaries
    return budget, limit


def _choose_node_tile(n_nodes, r, m, l, itemsize, vmem_budget_bytes, min_steps=4):
    """Largest node tile whose padding-aware footprint fits the VMEM budget,
    clamped so the grid keeps at least `min_steps` steps for pipelining /
    megacore sharding."""
    l_pad = _round_up(l, 128)                      # lane padding of merged minor dim
    # double-buffered streamed blocks (x in + out) per node, input dtype
    blocks_per_node = 2 * (r + m) * l_pad * itemsize
    # in-kernel f32 temporaries per node: hoisted x slices, accumulators,
    # and the stacked result before the single store
    scratch_per_node = (r + m + 4) * l_pad * 4
    per_node = blocks_per_node + scratch_per_node
    # resident weight block (f32), double-buffered by the default pipeline
    w_bytes = 2 * m * r * l_pad * 4

    avail = max(vmem_budget_bytes - w_bytes, per_node)
    nt = max(int(avail // per_node), 1)
    # keep >= min_steps grid steps so DMA-in / compute / DMA-out overlap and
    # both TensorCores get work on v7x
    nt = min(nt, max(pl.cdiv(n_nodes, min_steps), 1))
    if nt >= 8:
        nt = (nt // 8) * 8
    return max(min(nt, n_nodes), 1)


# ---------------------------------------------------------------------------
# Wrapper
# ---------------------------------------------------------------------------
def shared_radial_linear_transform(
    x, weights, group_ids, *, vmem_budget_bytes=None, vmem_limit_bytes=None
):
    """x: (N, R, A, H); weights: (G, R, M) f32; group_ids: (A,) int32 -> (N, M, A, H)."""
    N, R, A, H = x.shape
    G, R2, M = weights.shape
    assert R2 == R
    assert group_ids.shape == (A,)
    L = A * H

    default_budget, default_limit = _default_vmem_sizes()
    if vmem_limit_bytes is None:
        vmem_limit_bytes = default_limit
    if vmem_budget_bytes is None:
        vmem_budget_bytes = default_budget
    vmem_budget_bytes = min(vmem_budget_bytes, vmem_limit_bytes)  # consistent sizing

    # Tiny weight prep (<100 KiB): gather per angular index, keep float32
    # (no silent downcast), and lay out directly in the merged (M, R, A*H)
    # layout so the kernel does plain lane-aligned multiplies:
    #   w_b[m, r, a*H + h] = weights[group_ids[a], r, m]
    w_per_a = jnp.transpose(weights[group_ids].astype(jnp.float32), (2, 1, 0))  # (M, R, A)
    w_b = jnp.broadcast_to(w_per_a[..., None], (M, R, A, H)).reshape(M, R, L)

    # Free metadata reshape of the big input (contiguous).
    x_flat = x.reshape(N, R, L)

    nt = _choose_node_tile(
        N, R, M, L, jnp.dtype(x.dtype).itemsize, vmem_budget_bytes
    )
    grid = (pl.cdiv(N, nt),)

    out_flat = pl.pallas_call(
        _radial_transform_kernel,
        out_shape=jax.ShapeDtypeStruct((N, M, L), x.dtype),
        grid=grid,
        in_specs=[
            # Streamed node block of x, native layout (no HBM transpose).
            pl.BlockSpec((nt, R, L), lambda n: (n, 0, 0)),
            # Weights: single block, constant index_map -> DMA'd once, resident.
            pl.BlockSpec((M, R, L), lambda n: (0, 0, 0)),
        ],
        out_specs=pl.BlockSpec((nt, M, L), lambda n: (n, 0, 0)),
        compiler_params=pltpu.CompilerParams(
            dimension_semantics=("parallel",),   # shard node grid on v7x's 2 TCs
            vmem_limit_bytes=vmem_limit_bytes,   # generation-aware explicit limit
        ),
    )(x_flat, w_b)

    return out_flat.reshape(N, M, A, H)


# ---------------------------------------------------------------------------
# Pure-JAX reference (matches the PyTorch forward)
# ---------------------------------------------------------------------------
def reference(x, weights, group_ids):
    w_per_k = weights[group_ids]  # (A, R, M)
    return jnp.einsum(
        "nrah,arm->nmah", x, w_per_k, precision=jax.lax.Precision.HIGHEST
    )


if __name__ == "__main__":
    # Module config
    max_l = 2
    radial_dim = 8
    radial_embedding_dim = 8
    # channel_dim = None

    group_ids, num_groups, angular_dim = make_group_ids(max_l)  # A = 10 for max_l=2

    # Small deterministic inputs
    n_nodes = 16
    embedding_dim = 16
    key = jax.random.PRNGKey(0)
    kx, kw = jax.random.split(key)
    x = jax.random.normal(
        kx, (n_nodes, radial_dim, angular_dim, embedding_dim), dtype=jnp.float32
    )
    weights = init_weights(kw, num_groups, radial_dim, radial_embedding_dim)

    out = jax.block_until_ready(shared_radial_linear_transform(x, weights, group_ids))
    ref = jax.block_until_ready(reference(x, weights, group_ids))

    assert out.shape == (n_nodes, radial_embedding_dim, angular_dim, embedding_dim)
    np.testing.assert_allclose(np.asarray(out), np.asarray(ref), rtol=1e-5, atol=1e-5)

    print("KERNEL_OK")
</pallas_src>

<mosaic_0001>
module attributes {stable_mosaic.version = 11 : i64} {
  func.func @_radial_transform_kernel(%arg0: i32, %arg1: memref<4x8x160xf32, #tpu.memory_space<vmem>>, %arg2: memref<8x8x160xf32, #tpu.memory_space<vmem>>, %arg3: memref<4x8x160xf32, #tpu.memory_space<vmem>>) attributes {dimension_semantics = [#tpu.dimension_semantics<parallel>], iteration_bounds = array<i64: 4>, scalar_prefetch = 0 : i64, scratch_operands = 0 : i64, tpu.core_type = #tpu.core_type<tc>, window_params = [{transform_indices = @transform_0, window_bounds = array<i64: 4, 8, 160>}, {pipeline_mode = #tpu.pipeline_mode<synchronous>, transform_indices = @transform_1, window_bounds = array<i64: 8, 8, 160>}, {transform_indices = @transform_2, window_bounds = array<i64: 4, 8, 160>}]} {
    %c0 = arith.constant 0 : index
    %c0_0 = arith.constant 0 : index
    %c0_1 = arith.constant 0 : index
    %0 = vector.load %arg1[%c0, %c0_0, %c0_1] : memref<4x8x160xf32, #tpu.memory_space<vmem>>, vector<4x1x160xf32>
    %1 = vector.shape_cast %0 : vector<4x1x160xf32> to vector<4x160xf32>
    %c0_2 = arith.constant 0 : index
    %c1 = arith.constant 1 : index
    %c0_3 = arith.constant 0 : index
    %2 = vector.load %arg1[%c0_2, %c1, %c0_3] : memref<4x8x160xf32, #tpu.memory_space<vmem>>, vector<4x1x160xf32>
    %3 = vector.shape_cast %2 : vector<4x1x160xf32> to vector<4x160xf32>
    %c0_4 = arith.constant 0 : index
    %c2 = arith.constant 2 : index
    %c0_5 = arith.constant 0 : index
    %4 = vector.load %arg1[%c0_4, %c2, %c0_5] : memref<4x8x160xf32, #tpu.memory_space<vmem>>, vector<4x1x160xf32>
    %5 = vector.shape_cast %4 : vector<4x1x160xf32> to vector<4x160xf32>
    %c0_6 = arith.constant 0 : index
    %c3 = arith.constant 3 : index
    %c0_7 = arith.constant 0 : index
    %6 = vector.load %arg1[%c0_6, %c3, %c0_7] : memref<4x8x160xf32, #tpu.memory_space<vmem>>, vector<4x1x160xf32>
    %7 = vector.shape_cast %6 : vector<4x1x160xf32> to vector<4x160xf32>
    %c0_8 = arith.constant 0 : index
    %c4 = arith.constant 4 : index
    %c0_9 = arith.constant 0 : index
    %8 = vector.load %arg1[%c0_8, %c4, %c0_9] : memref<4x8x160xf32, #tpu.memory_space<vmem>>, vector<4x1x160xf32>
    %9 = vector.shape_cast %8 : vector<4x1x160xf32> to vector<4x160xf32>
    %c0_10 = arith.constant 0 : index
    %c5 = arith.constant 5 : index
    %c0_11 = arith.constant 0 : index
    %10 = vector.load %arg1[%c0_10, %c5, %c0_11] : memref<4x8x160xf32, #tpu.memory_space<vmem>>, vector<4x1x160xf32>
    %11 = vector.shape_cast %10 : vector<4x1x160xf32> to vector<4x160xf32>
    %c0_12 = arith.constant 0 : index
    %c6 = arith.constant 6 : index
    %c0_13 = arith.constant 0 : index
    %12 = vector.load %arg1[%c0_12, %c6, %c0_13] : memref<4x8x160xf32, #tpu.memory_space<vmem>>, vector<4x1x160xf32>
    %13 = vector.shape_cast %12 : vector<4x1x160xf32> to vector<4x160xf32>
    %c0_14 = arith.constant 0 : index
    %c7 = arith.constant 7 : index
    %c0_15 = arith.constant 0 : index
    %14 = vector.load %arg1[%c0_14, %c7, %c0_15] : memref<4x8x160xf32, #tpu.memory_space<vmem>>, vector<4x1x160xf32>
    %15 = vector.shape_cast %14 : vector<4x1x160xf32> to vector<4x160xf32>
    %c0_16 = arith.constant 0 : index
    %c0_17 = arith.constant 0 : index
    %c0_18 = arith.constant 0 : index
    %16 = vector.load %arg2[%c0_16, %c0_17, %c0_18] : memref<8x8x160xf32, #tpu.memory_space<vmem>>, vector<1x1x160xf32>
    %17 = vector.shape_cast %16 : vector<1x1x160xf32> to vector<1x160xf32>
    %18 = vector.broadcast %17 : vector<1x160xf32> to vector<4x160xf32>
    %19 = arith.mulf %1, %18 : vector<4x160xf32>
    %c0_19 = arith.constant 0 : index
    %c1_20 = arith.constant 1 : index
    %c0_21 = arith.constant 0 : index
    %20 = vector.load %arg2[%c0_19, %c1_20, %c0_21] : memref<8x8x160xf32, #tpu.memory_space<vmem>>, vector<1x1x160xf32>
    %21 = vector.shape_cast %20 : vector<1x1x160xf32> to vector<1x160xf32>
    %22 = vector.broadcast %21 : vector<1x160xf32> to vector<4x160xf32>
    %23 = arith.mulf %3, %22 : vector<4x160xf32>
    %24 = arith.addf %19, %23 : vector<4x160xf32>
    %c0_22 = arith.constant 0 : index
    %c2_23 = arith.constant 2 : index
    %c0_24 = arith.constant 0 : index
    %25 = vector.load %arg2[%c0_22, %c2_23, %c0_24] : memref<8x8x160xf32, #tpu.memory_space<vmem>>, vector<1x1x160xf32>
    %26 = vector.shape_cast %25 : vector<1x1x160xf32> to vector<1x160xf32>
    %27 = vector.broadcast %26 : vector<1x160xf32> to vector<4x160xf32>
    %28 = arith.mulf %5, %27 : vector<4x160xf32>
    %29 = arith.addf %24, %28 : vector<4x160xf32>
    %c0_25 = arith.constant 0 : index
    %c3_26 = arith.constant 3 : index
    %c0_27 = arith.constant 0 : index
    %30 = vector.load %arg2[%c0_25, %c3_26, %c0_27] : memref<8x8x160xf32, #tpu.memory_space<vmem>>, vector<1x1x160xf32>
    %31 = vector.shape_cast %30 : vector<1x1x160xf32> to vector<1x160xf32>
    %32 = vector.broadcast %31 : vector<1x160xf32> to vector<4x160xf32>
    %33 = arith.mulf %7, %32 : vector<4x160xf32>
    %34 = arith.addf %29, %33 : vector<4x160xf32>
    %c0_28 = arith.constant 0 : index
    %c4_29 = arith.constant 4 : index
    %c0_30 = arith.constant 0 : index
    %35 = vector.load %arg2[%c0_28, %c4_29, %c0_30] : memref<8x8x160xf32, #tpu.memory_space<vmem>>, vector<1x1x160xf32>
    %36 = vector.shape_cast %35 : vector<1x1x160xf32> to vector<1x160xf32>
    %37 = vector.broadcast %36 : vector<1x160xf32> to vector<4x160xf32>
    %38 = arith.mulf %9, %37 : vector<4x160xf32>
    %39 = arith.addf %34, %38 : vector<4x160xf32>
    %c0_31 = arith.constant 0 : index
    %c5_32 = arith.constant 5 : index
    %c0_33 = arith.constant 0 : index
    %40 = vector.load %arg2[%c0_31, %c5_32, %c0_33] : memref<8x8x160xf32, #tpu.memory_space<vmem>>, vector<1x1x160xf32>
    %41 = vector.shape_cast %40 : vector<1x1x160xf32> to vector<1x160xf32>
    %42 = vector.broadcast %41 : vector<1x160xf32> to vector<4x160xf32>
    %43 = arith.mulf %11, %42 : vector<4x160xf32>
    %44 = arith.addf %39, %43 : vector<4x160xf32>
    %c0_34 = arith.constant 0 : index
    %c6_35 = arith.constant 6 : index
    %c0_36 = arith.constant 0 : index
    %45 = vector.load %arg2[%c0_34, %c6_35, %c0_36] : memref<8x8x160xf32, #tpu.memory_space<vmem>>, vector<1x1x160xf32>
    %46 = vector.shape_cast %45 : vector<1x1x160xf32> to vector<1x160xf32>
    %47 = vector.broadcast %46 : vector<1x160xf32> to vector<4x160xf32>
    %48 = arith.mulf %13, %47 : vector<4x160xf32>
    %49 = arith.addf %44, %48 : vector<4x160xf32>
    %c0_37 = arith.constant 0 : index
    %c7_38 = arith.constant 7 : index
    %c0_39 = arith.constant 0 : index
    %50 = vector.load %arg2[%c0_37, %c7_38, %c0_39] : memref<8x8x160xf32, #tpu.memory_space<vmem>>, vector<1x1x160xf32>
    %51 = vector.shape_cast %50 : vector<1x1x160xf32> to vector<1x160xf32>
    %52 = vector.broadcast %51 : vector<1x160xf32> to vector<4x160xf32>
    %53 = arith.mulf %15, %52 : vector<4x160xf32>
    %54 = arith.addf %49, %53 : vector<4x160xf32>
    %c1_40 = arith.constant 1 : index
    %c0_41 = arith.constant 0 : index
    %c0_42 = arith.constant 0 : index
    %55 = vector.load %arg2[%c1_40, %c0_41, %c0_42] : memref<8x8x160xf32, #tpu.memory_space<vmem>>, vector<1x1x160xf32>
    %56 = vector.shape_cast %55 : vector<1x1x160xf32> to vector<1x160xf32>
    %57 = vector.broadcast %56 : vector<1x160xf32> to vector<4x160xf32>
    %58 = arith.mulf %1, %57 : vector<4x160xf32>
    %c1_43 = arith.constant 1 : index
    %c1_44 = arith.constant 1 : index
    %c0_45 = arith.constant 0 : index
    %59 = vector.load %arg2[%c1_43, %c1_44, %c0_45] : memref<8x8x160xf32, #tpu.memory_space<vmem>>, vector<1x1x160xf32>
    %60 = vector.shape_cast %59 : vector<1x1x160xf32> to vector<1x160xf32>
    %61 = vector.broadcast %60 : vector<1x160xf32> to vector<4x160xf32>
    %62 = arith.mulf %3, %61 : vector<4x160xf32>
    %63 = arith.addf %58, %62 : vector<4x160xf32>
    %c1_46 = arith.constant 1 : index
    %c2_47 = arith.constant 2 : index
    %c0_48 = arith.constant 0 : index
    %64 = vector.load %arg2[%c1_46, %c2_47, %c0_48] : memref<8x8x160xf32, #tpu.memory_space<vmem>>, vector<1x1x160xf32>
    %65 = vector.shape_cast %64 : vector<1x1x160xf32> to vector<1x160xf32>
    %66 = vector.broadcast %65 : vector<1x160xf32> to vector<4x160xf32>
    %67 = arith.mulf %5, %66 : vector<4x160xf32>
    %68 = arith.addf %63, %67 : vector<4x160xf32>
    %c1_49 = arith.constant 1 : index
    %c3_50 = arith.constant 3 : index
    %c0_51 = arith.constant 0 : index
    %69 = vector.load %arg2[%c1_49, %c3_50, %c0_51] : memref<8x8x160xf32, #tpu.memory_space<vmem>>, vector<1x1x160xf32>
    %70 = vector.shape_cast %69 : vector<1x1x160xf32> to vector<1x160xf32>
    %71 = vector.broadcast %70 : vector<1x160xf32> to vector<4x160xf32>
    %72 = arith.mulf %7, %71 : vector<4x160xf32>
    %73 = arith.addf %68, %72 : vector<4x160xf32>
    %c1_52 = arith.constant 1 : index
    %c4_53 = arith.constant 4 : index
    %c0_54 = arith.constant 0 : index
    %74 = vector.load %arg2[%c1_52, %c4_53, %c0_54] : memref<8x8x160xf32, #tpu.memory_space<vmem>>, vector<1x1x160xf32>
    %75 = vector.shape_cast %74 : vector<1x1x160xf32> to vector<1x160xf32>
    %76 = vector.broadcast %75 : vector<1x160xf32> to vector<4x160xf32>
    %77 = arith.mulf %9, %76 : vector<4x160xf32>
    %78 = arith.addf %73, %77 : vector<4x160xf32>
    %c1_55 = arith.constant 1 : index
    %c5_56 = arith.constant 5 : index
    %c0_57 = arith.constant 0 : index
    %79 = vector.load %arg2[%c1_55, %c5_56, %c0_57] : memref<8x8x160xf32, #tpu.memory_space<vmem>>, vector<1x1x160xf32>
    %80 = vector.shape_cast %79 : vector<1x1x160xf32> to vector<1x160xf32>
    %81 = vector.broadcast %80 : vector<1x160xf32> to vector<4x160xf32>
    %82 = arith.mulf %11, %81 : vector<4x160xf32>
    %83 = arith.addf %78, %82 : vector<4x160xf32>
    %c1_58 = arith.constant 1 : index
    %c6_59 = arith.constant 6 : index
    %c0_60 = arith.constant 0 : index
    %84 = vector.load %arg2[%c1_58, %c6_59, %c0_60] : memref<8x8x160xf32, #tpu.memory_space<vmem>>, vector<1x1x160xf32>
    %85 = vector.shape_cast %84 : vector<1x1x160xf32> to vector<1x160xf32>
    %86 = vector.broadcast %85 : vector<1x160xf32> to vector<4x160xf32>
    %87 = arith.mulf %13, %86 : vector<4x160xf32>
    %88 = arith.addf %83, %87 : vector<4x160xf32>
    %c1_61 = arith.constant 1 : index
    %c7_62 = arith.constant 7 : index
    %c0_63 = arith.constant 0 : index
    %89 = vector.load %arg2[%c1_61, %c7_62, %c0_63] : memref<8x8x160xf32, #tpu.memory_space<vmem>>, vector<1x1x160xf32>
    %90 = vector.shape_cast %89 : vector<1x1x160xf32> to vector<1x160xf32>
    %91 = vector.broadcast %90 : vector<1x160xf32> to vector<4x160xf32>
    %92 = arith.mulf %15, %91 : vector<4x160xf32>
    %93 = arith.addf %88, %92 : vector<4x160xf32>
    %c2_64 = arith.constant 2 : index
    %c0_65 = arith.constant 0 : index
    %c0_66 = arith.constant 0 : index
    %94 = vector.load %arg2[%c2_64, %c0_65, %c0_66] : memref<8x8x160xf32, #tpu.memory_space<vmem>>, vector<1x1x160xf32>
    %95 = vector.shape_cast %94 : vector<1x1x160xf32> to vector<1x160xf32>
    %96 = vector.broadcast %95 : vector<1x160xf32> to vector<4x160xf32>
    %97 = arith.mulf %1, %96 : vector<4x160xf32>
    %c2_67 = arith.constant 2 : index
    %c1_68 = arith.constant 1 : index
    %c0_69 = arith.constant 0 : index
    %98 = vector.load %arg2[%c2_67, %c1_68, %c0_69] : memref<8x8x160xf32, #tpu.memory_space<vmem>>, vector<1x1x160xf32>
    %99 = vector.shape_cast %98 : vector<1x1x160xf32> to vector<1x160xf32>
    %100 = vector.broadcast %99 : vector<1x160xf32> to vector<4x160xf32>
    %101 = arith.mulf %3, %100 : vector<4x160xf32>
    %102 = arith.addf %97, %101 : vector<4x160xf32>
    %c2_70 = arith.constant 2 : index
    %c2_71 = arith.constant 2 : index
    %c0_72 = arith.constant 0 : index
    %103 = vector.load %arg2[%c2_70, %c2_71, %c0_72] : memref<8x8x160xf32, #tpu.memory_space<vmem>>, vector<1x1x160xf32>
    %104 = vector.shape_cast %103 : vector<1x1x160xf32> to vector<1x160xf32>
    %105 = vector.broadcast %104 : vector<1x160xf32> to vector<4x160xf32>
    %106 = arith.mulf %5, %105 : vector<4x160xf32>
    %107 = arith.addf %102, %106 : vector<4x160xf32>
    %c2_73 = arith.constant 2 : index
    %c3_74 = arith.constant 3 : index
    %c0_75 = arith.constant 0 : index
    %108 = vector.load %arg2[%c2_73, %c3_74, %c0_75] : memref<8x8x160xf32, #tpu.memory_space<vmem>>, vector<1x1x160xf32>
    %109 = vector.shape_cast %108 : vector<1x1x160xf32> to vector<1x160xf32>
    %110 = vector.broadcast %109 : vector<1x160xf32> to vector<4x160xf32>
    %111 = arith.mulf %7, %110 : vector<4x160xf32>
    %112 = arith.addf %107, %111 : vector<4x160xf32>
    %c2_76 = arith.constant 2 : index
    %c4_77 = arith.constant 4 : index
    %c0_78 = arith.constant 0 : index
    %113 = vector.load %arg2[%c2_76, %c4_77, %c0_78] : memref<8x8x160xf32, #tpu.memory_space<vmem>>, vector<1x1x160xf32>
    %114 = vector.shape_cast %113 : vector<1x1x160xf32> to vector<1x160xf32>
    %115 = vector.broadcast %114 : vector<1x160xf32> to vector<4x160xf32>
    %116 = arith.mulf %9, %115 : vector<4x160xf32>
    %117 = arith.addf %112, %116 : vector<4x160xf32>
    %c2_79 = arith.constant 2 : index
    %c5_80 = arith.constant 5 : index
    %c0_81 = arith.constant 0 : index
    %118 = vector.load %arg2[%c2_79, %c5_80, %c0_81] : memref<8x8x160xf32, #tpu.memory_space<vmem>>, vector<1x1x160xf32>
    %119 = vector.shape_cast %118 : vector<1x1x160xf32> to vector<1x160xf32>
    %120 = vector.broadcast %119 : vector<1x160xf32> to vector<4x160xf32>
    %121 = arith.mulf %11, %120 : vector<4x160xf32>
    %122 = arith.addf %117, %121 : vector<4x160xf32>
    %c2_82 = arith.constant 2 : index
    %c6_83 = arith.constant 6 : index
    %c0_84 = arith.constant 0 : index
    %123 = vector.load %arg2[%c2_82, %c6_83, %c0_84] : memref<8x8x160xf32, #tpu.memory_space<vmem>>, vector<1x1x160xf32>
    %124 = vector.shape_cast %123 : vector<1x1x160xf32> to vector<1x160xf32>
    %125 = vector.broadcast %124 : vector<1x160xf32> to vector<4x160xf32>
    %126 = arith.mulf %13, %125 : vector<4x160xf32>
    %127 = arith.addf %122, %126 : vector<4x160xf32>
    %c2_85 = arith.constant 2 : index
    %c7_86 = arith.constant 7 : index
    %c0_87 = arith.constant 0 : index
    %128 = vector.load %arg2[%c2_85, %c7_86, %c0_87] : memref<8x8x160xf32, #tpu.memory_space<vmem>>, vector<1x1x160xf32>
    %129 = vector.shape_cast %128 : vector<1x1x160xf32> to vector<1x160xf32>
    %130 = vector.broadcast %129 : vector<1x160xf32> to vector<4x160xf32>
    %131 = arith.mulf %15, %130 : vector<4x160xf32>
    %132 = arith.addf %127, %131 : vector<4x160xf32>
    %c3_88 = arith.constant 3 : index
    %c0_89 = arith.constant 0 : index
    %c0_90 = arith.constant 0 : index
    %133 = vector.load %arg2[%c3_88, %c0_89, %c0_90] : memref<8x8x160xf32, #tpu.memory_space<vmem>>, vector<1x1x160xf32>
    %134 = vector.shape_cast %133 : vector<1x1x160xf32> to vector<1x160xf32>
    %135 = vector.broadcast %134 : vector<1x160xf32> to vector<4x160xf32>
    %136 = arith.mulf %1, %135 : vector<4x160xf32>
    %c3_91 = arith.constant 3 : index
    %c1_92 = arith.constant 1 : index
    %c0_93 = arith.constant 0 : index
    %137 = vector.load %arg2[%c3_91, %c1_92, %c0_93] : memref<8x8x160xf32, #tpu.memory_space<vmem>>, vector<1x1x160xf32>
    %138 = vector.shape_cast %137 : vector<1x1x160xf32> to vector<1x160xf32>
    %139 = vector.broadcast %138 : vector<1x160xf32> to vector<4x160xf32>
    %140 = arith.mulf %3, %139 : vector<4x160xf32>
    %141 = arith.addf %136, %140 : vector<4x160xf32>
    %c3_94 = arith.constant 3 : index
    %c2_95 = arith.constant 2 : index
    %c0_96 = arith.constant 0 : index
    %142 = vector.load %arg2[%c3_94, %c2_95, %c0_96] : memref<8x8x160xf32, #tpu.memory_space<vmem>>, vector<1x1x160xf32>
    %143 = vector.shape_cast %142 : vector<1x1x160xf32> to vector<1x160xf32>
    %144 = vector.broadcast %143 : vector<1x160xf32> to vector<4x160xf32>
    %145 = arith.mulf %5, %144 : vector<4x160xf32>
    %146 = arith.addf %141, %145 : vector<4x160xf32>
    %c3_97 = arith.constant 3 : index
    %c3_98 = arith.constant 3 : index
    %c0_99 = arith.constant 0 : index
    %147 = vector.load %arg2[%c3_97, %c3_98, %c0_99] : memref<8x8x160xf32, #tpu.memory_space<vmem>>, vector<1x1x160xf32>
    %148 = vector.shape_cast %147 : vector<1x1x160xf32> to vector<1x160xf32>
    %149 = vector.broadcast %148 : vector<1x160xf32> to vector<4x160xf32>
    %150 = arith.mulf %7, %149 : vector<4x160xf32>
    %151 = arith.addf %146, %150 : vector<4x160xf32>
    %c3_100 = arith.constant 3 : index
    %c4_101 = arith.constant 4 : index
    %c0_102 = arith.constant 0 : index
    %152 = vector.load %arg2[%c3_100, %c4_101, %c0_102] : memref<8x8x160xf32, #tpu.memory_space<vmem>>, vector<1x1x160xf32>
    %153 = vector.shape_cast %152 : vector<1x1x160xf32> to vector<1x160xf32>
    %154 = vector.broadcast %153 : vector<1x160xf32> to vector<4x160xf32>
    %155 = arith.mulf %9, %154 : vector<4x160xf32>
    %156 = arith.addf %151, %155 : vector<4x160xf32>
    %c3_103 = arith.constant 3 : index
    %c5_104 = arith.constant 5 : index
    %c0_105 = arith.constant 0 : index
    %157 = vector.load %arg2[%c3_103, %c5_104, %c0_105] : memref<8x8x160xf32, #tpu.memory_space<vmem>>, vector<1x1x160xf32>
    %158 = vector.shape_cast %157 : vector<1x1x160xf32> to vector<1x160xf32>
    %159 = vector.broadcast %158 : vector<1x160xf32> to vector<4x160xf32>
    %160 = arith.mulf %11, %159 : vector<4x160xf32>
    %161 = arith.addf %156, %160 : vector<4x160xf32>
    %c3_106 = arith.constant 3 : index
    %c6_107 = arith.constant 6 : index
    %c0_108 = arith.constant 0 : index
    %162 = vector.load %arg2[%c3_106, %c6_107, %c0_108] : memref<8x8x160xf32, #tpu.memory_space<vmem>>, vector<1x1x160xf32>
    %163 = vector.shape_cast %162 : vector<1x1x160xf32> to vector<1x160xf32>
    %164 = vector.broadcast %163 : vector<1x160xf32> to vector<4x160xf32>
    %165 = arith.mulf %13, %164 : vector<4x160xf32>
    %166 = arith.addf %161, %165 : vector<4x160xf32>
    %c3_109 = arith.constant 3 : index
    %c7_110 = arith.constant 7 : index
    %c0_111 = arith.constant 0 : index
    %167 = vector.load %arg2[%c3_109, %c7_110, %c0_111] : memref<8x8x160xf32, #tpu.memory_space<vmem>>, vector<1x1x160xf32>
    %168 = vector.shape_cast %167 : vector<1x1x160xf32> to vector<1x160xf32>
    %169 = vector.broadcast %168 : vector<1x160xf32> to vector<4x160xf32>
    %170 = arith.mulf %15, %169 : vector<4x160xf32>
    %171 = arith.addf %166, %170 : vector<4x160xf32>
    %c4_112 = arith.constant 4 : index
    %c0_113 = arith.constant 0 : index
    %c0_114 = arith.constant 0 : index
    %172 = vector.load %arg2[%c4_112, %c0_113, %c0_114] : memref<8x8x160xf32, #tpu.memory_space<vmem>>, vector<1x1x160xf32>
    %173 = vector.shape_cast %172 : vector<1x1x160xf32> to vector<1x160xf32>
    %174 = vector.broadcast %173 : vector<1x160xf32> to vector<4x160xf32>
    %175 = arith.mulf %1, %174 : vector<4x160xf32>
    %c4_115 = arith.constant 4 : index
    %c1_116 = arith.constant 1 : index
    %c0_117 = arith.constant 0 : index
    %176 = vector.load %arg2[%c4_115, %c1_116, %c0_117] : memref<8x8x160xf32, #tpu.memory_space<vmem>>, vector<1x1x160xf32>
    %177 = vector.shape_cast %176 : vector<1x1x160xf32> to vector<1x160xf32>
    %178 = vector.broadcast %177 : vector<1x160xf32> to vector<4x160xf32>
    %179 = arith.mulf %3, %178 : vector<4x160xf32>
    %180 = arith.addf %175, %179 : vector<4x160xf32>
    %c4_118 = arith.constant 4 : index
    %c2_119 = arith.constant 2 : index
    %c0_120 = arith.constant 0 : index
    %181 = vector.load %arg2[%c4_118, %c2_119, %c0_120] : memref<8x8x160xf32, #tpu.memory_space<vmem>>, vector<1x1x160xf32>
    %182 = vector.shape_cast %181 : vector<1x1x160xf32> to vector<1x160xf32>
    %183 = vector.broadcast %182 : vector<1x160xf32> to vector<4x160xf32>
    %184 = arith.mulf %5, %183 : vector<4x160xf32>
    %185 = arith.addf %180, %184 : vector<4x160xf32>
    %c4_121 = arith.constant 4 : index
    %c3_122 = arith.constant 3 : index
    %c0_123 = arith.constant 0 : index
    %186 = vector.load %arg2[%c4_121, %c3_122, %c0_123] : memref<8x8x160xf32, #tpu.memory_space<vmem>>, vector<1x1x160xf32>
    %187 = vector.shape_cast %186 : vector<1x1x160xf32> to vector<1x160xf32>
    %188 = vector.broadcast %187 : vector<1x160xf32> to vector<4x160xf32>
    %189 = arith.mulf %7, %188 : vector<4x160xf32>
    %190 = arith.addf %185, %189 : vector<4x160xf32>
    %c4_124 = arith.constant 4 : index
    %c4_125 = arith.constant 4 : index
    %c0_126 = arith.constant 0 : index
    %191 = vector.load %arg2[%c4_124, %c4_125, %c0_126] : memref<8x8x160xf32, #tpu.memory_space<vmem>>, vector<1x1x160xf32>
    %192 = vector.shape_cast %191 : vector<1x1x160xf32> to vector<1x160xf32>
    %193 = vector.broadcast %192 : vector<1x160xf32> to vector<4x160xf32>
    %194 = arith.mulf %9, %193 : vector<4x160xf32>
    %195 = arith.addf %190, %194 : vector<4x160xf32>
    %c4_127 = arith.constant 4 : index
    %c5_128 = arith.constant 5 : index
    %c0_129 = arith.constant 0 : index
    %196 = vector.load %arg2[%c4_127, %c5_128, %c0_129] : memref<8x8x160xf32, #tpu.memory_space<vmem>>, vector<1x1x160xf32>
    %197 = vector.shape_cast %196 : vector<1x1x160xf32> to vector<1x160xf32>
    %198 = vector.broadcast %197 : vector<1x160xf32> to vector<4x160xf32>
    %199 = arith.mulf %11, %198 : vector<4x160xf32>
    %200 = arith.addf %195, %199 : vector<4x160xf32>
    %c4_130 = arith.constant 4 : index
    %c6_131 = arith.constant 6 : index
    %c0_132 = arith.constant 0 : index
    %201 = vector.load %arg2[%c4_130, %c6_131, %c0_132] : memref<8x8x160xf32, #tpu.memory_space<vmem>>, vector<1x1x160xf32>
    %202 = vector.shape_cast %201 : vector<1x1x160xf32> to vector<1x160xf32>
    %203 = vector.broadcast %202 : vector<1x160xf32> to vector<4x160xf32>
    %204 = arith.mulf %13, %203 : vector<4x160xf32>
    %205 = arith.addf %200, %204 : vector<4x160xf32>
    %c4_133 = arith.constant 4 : index
    %c7_134 = arith.constant 7 : index
    %c0_135 = arith.constant 0 : index
    %206 = vector.load %arg2[%c4_133, %c7_134, %c0_135] : memref<8x8x160xf32, #tpu.memory_space<vmem>>, vector<1x1x160xf32>
    %207 = vector.shape_cast %206 : vector<1x1x160xf32> to vector<1x160xf32>
    %208 = vector.broadcast %207 : vector<1x160xf32> to vector<4x160xf32>
    %209 = arith.mulf %15, %208 : vector<4x160xf32>
    %210 = arith.addf %205, %209 : vector<4x160xf32>
    %c5_136 = arith.constant 5 : index
    %c0_137 = arith.constant 0 : index
    %c0_138 = arith.constant 0 : index
    %211 = vector.load %arg2[%c5_136, %c0_137, %c0_138] : memref<8x8x160xf32, #tpu.memory_space<vmem>>, vector<1x1x160xf32>
    %212 = vector.shape_cast %211 : vector<1x1x160xf32> to vector<1x160xf32>
    %213 = vector.broadcast %212 : vector<1x160xf32> to vector<4x160xf32>
    %214 = arith.mulf %1, %213 : vector<4x160xf32>
    %c5_139 = arith.constant 5 : index
    %c1_140 = arith.constant 1 : index
    %c0_141 = arith.constant 0 : index
    %215 = vector.load %arg2[%c5_139, %c1_140, %c0_141] : memref<8x8x160xf32, #tpu.memory_space<vmem>>, vector<1x1x160xf32>
    %216 = vector.shape_cast %215 : vector<1x1x160xf32> to vector<1x160xf32>
    %217 = vector.broadcast %216 : vector<1x160xf32> to vector<4x160xf32>
    %218 = arith.mulf %3, %217 : vector<4x160xf32>
    %219 = arith.addf %214, %218 : vector<4x160xf32>
    %c5_142 = arith.constant 5 : index
    %c2_143 = arith.constant 2 : index
    %c0_144 = arith.constant 0 : index
    %220 = vector.load %arg2[%c5_142, %c2_143, %c0_144] : memref<8x8x160xf32, #tpu.memory_space<vmem>>, vector<1x1x160xf32>
    %221 = vector.shape_cast %220 : vector<1x1x160xf32> to vector<1x160xf32>
    %222 = vector.broadcast %221 : vector<1x160xf32> to vector<4x160xf32>
    %223 = arith.mulf %5, %222 : vector<4x160xf32>
    %224 = arith.addf %219, %223 : vector<4x160xf32>
    %c5_145 = arith.constant 5 : index
    %c3_146 = arith.constant 3 : index
    %c0_147 = arith.constant 0 : index
    %225 = vector.load %arg2[%c5_145, %c3_146, %c0_147] : memref<8x8x160xf32, #tpu.memory_space<vmem>>, vector<1x1x160xf32>
    %226 = vector.shape_cast %225 : vector<1x1x160xf32> to vector<1x160xf32>
    %227 = vector.broadcast %226 : vector<1x160xf32> to vector<4x160xf32>
    %228 = arith.mulf %7, %227 : vector<4x160xf32>
    %229 = arith.addf %224, %228 : vector<4x160xf32>
    %c5_148 = arith.constant 5 : index
    %c4_149 = arith.constant 4 : index
    %c0_150 = arith.constant 0 : index
    %230 = vector.load %arg2[%c5_148, %c4_149, %c0_150] : memref<8x8x160xf32, #tpu.memory_space<vmem>>, vector<1x1x160xf32>
    %231 = vector.shape_cast %230 : vector<1x1x160xf32> to vector<1x160xf32>
    %232 = vector.broadcast %231 : vector<1x160xf32> to vector<4x160xf32>
    %233 = arith.mulf %9, %232 : vector<4x160xf32>
    %234 = arith.addf %229, %233 : vector<4x160xf32>
    %c5_151 = arith.constant 5 : index
    %c5_152 = arith.constant 5 : index
    %c0_153 = arith.constant 0 : index
    %235 = vector.load %arg2[%c5_151, %c5_152, %c0_153] : memref<8x8x160xf32, #tpu.memory_space<vmem>>, vector<1x1x160xf32>
    %236 = vector.shape_cast %235 : vector<1x1x160xf32> to vector<1x160xf32>
    %237 = vector.broadcast %236 : vector<1x160xf32> to vector<4x160xf32>
    %238 = arith.mulf %11, %237 : vector<4x160xf32>
    %239 = arith.addf %234, %238 : vector<4x160xf32>
    %c5_154 = arith.constant 5 : index
    %c6_155 = arith.constant 6 : index
    %c0_156 = arith.constant 0 : index
    %240 = vector.load %arg2[%c5_154, %c6_155, %c0_156] : memref<8x8x160xf32, #tpu.memory_space<vmem>>, vector<1x1x160xf32>
    %241 = vector.shape_cast %240 : vector<1x1x160xf32> to vector<1x160xf32>
    %242 = vector.broadcast %241 : vector<1x160xf32> to vector<4x160xf32>
    %243 = arith.mulf %13, %242 : vector<4x160xf32>
    %244 = arith.addf %239, %243 : vector<4x160xf32>
    %c5_157 = arith.constant 5 : index
    %c7_158 = arith.constant 7 : index
    %c0_159 = arith.constant 0 : index
    %245 = vector.load %arg2[%c5_157, %c7_158, %c0_159] : memref<8x8x160xf32, #tpu.memory_space<vmem>>, vector<1x1x160xf32>
    %246 = vector.shape_cast %245 : vector<1x1x160xf32> to vector<1x160xf32>
    %247 = vector.broadcast %246 : vector<1x160xf32> to vector<4x160xf32>
    %248 = arith.mulf %15, %247 : vector<4x160xf32>
    %249 = arith.addf %244, %248 : vector<4x160xf32>
    %c6_160 = arith.constant 6 : index
    %c0_161 = arith.constant 0 : index
    %c0_162 = arith.constant 0 : index
    %250 = vector.load %arg2[%c6_160, %c0_161, %c0_162] : memref<8x8x160xf32, #tpu.memory_space<vmem>>, vector<1x1x160xf32>
    %251 = vector.shape_cast %250 : vector<1x1x160xf32> to vector<1x160xf32>
    %252 = vector.broadcast %251 : vector<1x160xf32> to vector<4x160xf32>
    %253 = arith.mulf %1, %252 : vector<4x160xf32>
    %c6_163 = arith.constant 6 : index
    %c1_164 = arith.constant 1 : index
    %c0_165 = arith.constant 0 : index
    %254 = vector.load %arg2[%c6_163, %c1_164, %c0_165] : memref<8x8x160xf32, #tpu.memory_space<vmem>>, vector<1x1x160xf32>
    %255 = vector.shape_cast %254 : vector<1x1x160xf32> to vector<1x160xf32>
    %256 = vector.broadcast %255 : vector<1x160xf32> to vector<4x160xf32>
    %257 = arith.mulf %3, %256 : vector<4x160xf32>
    %258 = arith.addf %253, %257 : vector<4x160xf32>
    %c6_166 = arith.constant 6 : index
    %c2_167 = arith.constant 2 : index
    %c0_168 = arith.constant 0 : index
    %259 = vector.load %arg2[%c6_166, %c2_167, %c0_168] : memref<8x8x160xf32, #tpu.memory_space<vmem>>, vector<1x1x160xf32>
    %260 = vector.shape_cast %259 : vector<1x1x160xf32> to vector<1x160xf32>
    %261 = vector.broadcast %260 : vector<1x160xf32> to vector<4x160xf32>
    %262 = arith.mulf %5, %261 : vector<4x160xf32>
    %263 = arith.addf %258, %262 : vector<4x160xf32>
    %c6_169 = arith.constant 6 : index
    %c3_170 = arith.constant 3 : index
    %c0_171 = arith.constant 0 : index
    %264 = vector.load %arg2[%c6_169, %c3_170, %c0_171] : memref<8x8x160xf32, #tpu.memory_space<vmem>>, vector<1x1x160xf32>
    %265 = vector.shape_cast %264 : vector<1x1x160xf32> to vector<1x160xf32>
    %266 = vector.broadcast %265 : vector<1x160xf32> to vector<4x160xf32>
    %267 = arith.mulf %7, %266 : vector<4x160xf32>
    %268 = arith.addf %263, %267 : vector<4x160xf32>
    %c6_172 = arith.constant 6 : index
    %c4_173 = arith.constant 4 : index
    %c0_174 = arith.constant 0 : index
    %269 = vector.load %arg2[%c6_172, %c4_173, %c0_174] : memref<8x8x160xf32, #tpu.memory_space<vmem>>, vector<1x1x160xf32>
    %270 = vector.shape_cast %269 : vector<1x1x160xf32> to vector<1x160xf32>
    %271 = vector.broadcast %270 : vector<1x160xf32> to vector<4x160xf32>
    %272 = arith.mulf %9, %271 : vector<4x160xf32>
    %273 = arith.addf %268, %272 : vector<4x160xf32>
    %c6_175 = arith.constant 6 : index
    %c5_176 = arith.constant 5 : index
    %c0_177 = arith.constant 0 : index
    %274 = vector.load %arg2[%c6_175, %c5_176, %c0_177] : memref<8x8x160xf32, #tpu.memory_space<vmem>>, vector<1x1x160xf32>
    %275 = vector.shape_cast %274 : vector<1x1x160xf32> to vector<1x160xf32>
    %276 = vector.broadcast %275 : vector<1x160xf32> to vector<4x160xf32>
    %277 = arith.mulf %11, %276 : vector<4x160xf32>
    %278 = arith.addf %273, %277 : vector<4x160xf32>
    %c6_178 = arith.constant 6 : index
    %c6_179 = arith.constant 6 : index
    %c0_180 = arith.constant 0 : index
    %279 = vector.load %arg2[%c6_178, %c6_179, %c0_180] : memref<8x8x160xf32, #tpu.memory_space<vmem>>, vector<1x1x160xf32>
    %280 = vector.shape_cast %279 : vector<1x1x160xf32> to vector<1x160xf32>
    %281 = vector.broadcast %280 : vector<1x160xf32> to vector<4x160xf32>
    %282 = arith.mulf %13, %281 : vector<4x160xf32>
    %283 = arith.addf %278, %282 : vector<4x160xf32>
    %c6_181 = arith.constant 6 : index
    %c7_182 = arith.constant 7 : index
    %c0_183 = arith.constant 0 : index
    %284 = vector.load %arg2[%c6_181, %c7_182, %c0_183] : memref<8x8x160xf32, #tpu.memory_space<vmem>>, vector<1x1x160xf32>
    %285 = vector.shape_cast %284 : vector<1x1x160xf32> to vector<1x160xf32>
    %286 = vector.broadcast %285 : vector<1x160xf32> to vector<4x160xf32>
    %287 = arith.mulf %15, %286 : vector<4x160xf32>
    %288 = arith.addf %283, %287 : vector<4x160xf32>
    %c7_184 = arith.constant 7 : index
    %c0_185 = arith.constant 0 : index
    %c0_186 = arith.constant 0 : index
    %289 = vector.load %arg2[%c7_184, %c0_185, %c0_186] : memref<8x8x160xf32, #tpu.memory_space<vmem>>, vector<1x1x160xf32>
    %290 = vector.shape_cast %289 : vector<1x1x160xf32> to vector<1x160xf32>
    %291 = vector.broadcast %290 : vector<1x160xf32> to vector<4x160xf32>
    %292 = arith.mulf %1, %291 : vector<4x160xf32>
    %c7_187 = arith.constant 7 : index
    %c1_188 = arith.constant 1 : index
    %c0_189 = arith.constant 0 : index
    %293 = vector.load %arg2[%c7_187, %c1_188, %c0_189] : memref<8x8x160xf32, #tpu.memory_space<vmem>>, vector<1x1x160xf32>
    %294 = vector.shape_cast %293 : vector<1x1x160xf32> to vector<1x160xf32>
    %295 = vector.broadcast %294 : vector<1x160xf32> to vector<4x160xf32>
    %296 = arith.mulf %3, %295 : vector<4x160xf32>
    %297 = arith.addf %292, %296 : vector<4x160xf32>
    %c7_190 = arith.constant 7 : index
    %c2_191 = arith.constant 2 : index
    %c0_192 = arith.constant 0 : index
    %298 = vector.load %arg2[%c7_190, %c2_191, %c0_192] : memref<8x8x160xf32, #tpu.memory_space<vmem>>, vector<1x1x160xf32>
    %299 = vector.shape_cast %298 : vector<1x1x160xf32> to vector<1x160xf32>
    %300 = vector.broadcast %299 : vector<1x160xf32> to vector<4x160xf32>
    %301 = arith.mulf %5, %300 : vector<4x160xf32>
    %302 = arith.addf %297, %301 : vector<4x160xf32>
    %c7_193 = arith.constant 7 : index
    %c3_194 = arith.constant 3 : index
    %c0_195 = arith.constant 0 : index
    %303 = vector.load %arg2[%c7_193, %c3_194, %c0_195] : memref<8x8x160xf32, #tpu.memory_space<vmem>>, vector<1x1x160xf32>
    %304 = vector.shape_cast %303 : vector<1x1x160xf32> to vector<1x160xf32>
    %305 = vector.broadcast %304 : vector<1x160xf32> to vector<4x160xf32>
    %306 = arith.mulf %7, %305 : vector<4x160xf32>
    %307 = arith.addf %302, %306 : vector<4x160xf32>
    %c7_196 = arith.constant 7 : index
    %c4_197 = arith.constant 4 : index
    %c0_198 = arith.constant 0 : index
    %308 = vector.load %arg2[%c7_196, %c4_197, %c0_198] : memref<8x8x160xf32, #tpu.memory_space<vmem>>, vector<1x1x160xf32>
    %309 = vector.shape_cast %308 : vector<1x1x160xf32> to vector<1x160xf32>
    %310 = vector.broadcast %309 : vector<1x160xf32> to vector<4x160xf32>
    %311 = arith.mulf %9, %310 : vector<4x160xf32>
    %312 = arith.addf %307, %311 : vector<4x160xf32>
    %c7_199 = arith.constant 7 : index
    %c5_200 = arith.constant 5 : index
    %c0_201 = arith.constant 0 : index
    %313 = vector.load %arg2[%c7_199, %c5_200, %c0_201] : memref<8x8x160xf32, #tpu.memory_space<vmem>>, vector<1x1x160xf32>
    %314 = vector.shape_cast %313 : vector<1x1x160xf32> to vector<1x160xf32>
    %315 = vector.broadcast %314 : vector<1x160xf32> to vector<4x160xf32>
    %316 = arith.mulf %11, %315 : vector<4x160xf32>
    %317 = arith.addf %312, %316 : vector<4x160xf32>
    %c7_202 = arith.constant 7 : index
    %c6_203 = arith.constant 6 : index
    %c0_204 = arith.constant 0 : index
    %318 = vector.load %arg2[%c7_202, %c6_203, %c0_204] : memref<8x8x160xf32, #tpu.memory_space<vmem>>, vector<1x1x160xf32>
    %319 = vector.shape_cast %318 : vector<1x1x160xf32> to vector<1x160xf32>
    %320 = vector.broadcast %319 : vector<1x160xf32> to vector<4x160xf32>
    %321 = arith.mulf %13, %320 : vector<4x160xf32>
    %322 = arith.addf %317, %321 : vector<4x160xf32>
    %c7_205 = arith.constant 7 : index
    %c7_206 = arith.constant 7 : index
    %c0_207 = arith.constant 0 : index
    %323 = vector.load %arg2[%c7_205, %c7_206, %c0_207] : memref<8x8x160xf32, #tpu.memory_space<vmem>>, vector<1x1x160xf32>
    %324 = vector.shape_cast %323 : vector<1x1x160xf32> to vector<1x160xf32>
    %325 = vector.broadcast %324 : vector<1x160xf32> to vector<4x160xf32>
    %326 = arith.mulf %15, %325 : vector<4x160xf32>
    %327 = arith.addf %322, %326 : vector<4x160xf32>
    %328 = vector.shape_cast %54 : vector<4x160xf32> to vector<4x1x160xf32>
    %329 = vector.shape_cast %93 : vector<4x160xf32> to vector<4x1x160xf32>
    %330 = vector.shape_cast %132 : vector<4x160xf32> to vector<4x1x160xf32>
    %331 = vector.shape_cast %171 : vector<4x160xf32> to vector<4x1x160xf32>
    %332 = vector.shape_cast %210 : vector<4x160xf32> to vector<4x1x160xf32>
    %333 = vector.shape_cast %249 : vector<4x160xf32> to vector<4x1x160xf32>
    %334 = vector.shape_cast %288 : vector<4x160xf32> to vector<4x1x160xf32>
    %335 = vector.shape_cast %327 : vector<4x160xf32> to vector<4x1x160xf32>
    %336 = tpu.concatenate %328, %329, %330, %331, %332, %333, %334, %335 in 1 : vector<4x1x160xf32>, vector<4x1x160xf32>, vector<4x1x160xf32>, vector<4x1x160xf32>, vector<4x1x160xf32>, vector<4x1x160xf32>, vector<4x1x160xf32>, vector<4x1x160xf32> -> vector<4x8x160xf32>
    %c0_208 = arith.constant 0 : index
    %c0_209 = arith.constant 0 : index
    %c0_210 = arith.constant 0 : index
    %337 = vector.load %arg3[%c0_208, %c0_209, %c0_210] : memref<4x8x160xf32, #tpu.memory_space<vmem>>, vector<4x8x160xf32>
    tpu.vector_store %arg3[%c0_208, %c0_209, %c0_210], %336 {strides = array<i32>} : memref<4x8x160xf32, #tpu.memory_space<vmem>>, vector<4x8x160xf32>,
    return
  }
  func.func @transform_0(%arg0: i32) -> (i32, i32, i32) {
    %c0_i32 = arith.constant 0 : i32
    %c0_i32_0 = arith.constant 0 : i32
    %c0_i32_1 = arith.constant 0 : i32
    return %arg0, %c0_i32, %c0_i32_0 : i32, i32, i32
  }
  func.func @transform_1(%arg0: i32) -> (i32, i32, i32) {
    %c0_i32 = arith.constant 0 : i32
    %c0_i32_0 = arith.constant 0 : i32
    %c0_i32_1 = arith.constant 0 : i32
    %c0_i32_2 = arith.constant 0 : i32
    return %c0_i32, %c0_i32_0, %c0_i32_1 : i32, i32, i32
  }
  func.func @transform_2(%arg0: i32) -> (i32, i32, i32) {
    %c0_i32 = arith.constant 0 : i32
    %c0_i32_0 = arith.constant 0 : i32
    %c0_i32_1 = arith.constant 0 : i32
    return %arg0, %c0_i32, %c0_i32_0 : i32, i32, i32
  }
}

</mosaic_0001>

<bundles_post_ra>
// kernel: tpu_custom_call.1
= control target key start
LH: loop header
LB: loop body
LE: loop exit
PB: predicated region body
PF: predicated region fallthrough
CT: control target
= control target key end

     0   :  { %7 = vsyncpa [#allocation3], 0  ;;  %s5492_s0 = inlined_call_operand.hbm [shape: f32[16,8,160], index: 0, kind: input, shape index: {}]   ;;  %s5493_s1 = inlined_call_operand.hbm [shape: f32[8,8,160], index: 1, kind: input, shape index: {}]   ;;  %s5494_s2 = inlined_call_operand.hbm [shape: f32[16,8,160], index: 2, kind: output, shape index: {}]  }
   0x1   :  { %9 = vsyncpa [#allocation3 + $0x1], 0 }
   0x2   :  { %10 = vsyncpa [#allocation6], 0 }
   0x3   :  { %11 = vsyncpa [#allocation4], 0 }
   0x4   :  { %13 = vsyncpa [#allocation4 + $0x1], 0  ;;  %s4147_s9 = smov 0   ;;  %s4149_s10 = smov 0  }
   0x5   :  { %s4151_s11 = smov 0   ;;  %s4153_s12 = smov 0  }
   0x6 LB: > { %s4168_s13 = sadd.s32 4294967295, %s4122_s12   ;;  %s3853_s14 = sadd.s32 4294967294, %s4122_s12   ;;  %s4122_s12 = sphi %s4153_s12, %s5640_s12   ;;  %s4118_s11 = sphi %s4151_s11, %s5639_s11   ;;  %s4114_s10 = sphi %s4149_s10, %s5638_s10   ;;  %s4110_s9 = sphi %s4147_s9, %s5637_s9  }
   0x7   : > { %p39_p0 = scmp.ne.s32.totalorder %s4114_s10, %s4110_s9  ;;  %p5495_p1 = scmp.eq.s32.totalorder %s4168_s13, 0 }
   0x8   : > { %p90_p3 = scmp.eq.s32.totalorder %s3853_s14, 3  ;;  %p3854_p5 = scmp.ge.s32.totalorder %s4122_s12, 1 }
   0x9   : > { %p4177_p4 = por %p5495_p1, %p39_p0  ;;  %p97_p7 = scmp.lt.s32.totalorder %s4122_s12, 5 }
   0xa   : > { %p4182_p6 = por %p90_p3, %p39_p0  ;;  %s4124_s18 = smov [#allocation5]  }
   0xb   : > { %s5537_s15 = scalar_select %p4177_p4, 1, 0 }
   0xc   : > { %s5538_s16 = scalar_select %p4182_p6, 1, 0 }
   0xd   : > { %p4187_p8 = pnand %p3854_p5, %p97_p7  ;;  %s109_s19 = sshll.u32 %s4124_s18, 4  ;;  %s110_s19 = int_to_ptr.vmem [resolvable:$true] %s109_s19 }
   0xe   : > { %s4200_s21 = sadd.s32 1, %s4122_s12   ;;  %s26_s22 = sadd.s32 1, %s4118_s11 }
   0xf   : > { %s5539_s17 = scalar_select %p4187_p8, 1, 0 }
  0x10   : > { %p3914_p9 = pneg %p4187_p8  ;;  %s23_s23 = ssub.s32 %s4122_s12, %s4200_s21 }
  0x11   : > { %s4011_s24 = scalar_lea.vmem %s110_s19, 2048  ;;  %p4019_p3 = scmp.lt.s32.totalorder %s110_s19, %s110_s19 }
  0x12   : > { %p4195_p10 = pnand %p3914_p9, %p5495_p1  ;;  %p4012_p12 = scmp.ne.s32.totalorder %s110_s19, %s4011_s24 }
  0x13   : > { %p4020_p5 = scmp.lt.s32.totalorder %s4011_s24, %s4011_s24 }
  0x14   : > { %p4002_p11 = pneg %p4195_p10 }
  0x15   : > { %p4021_p7 = por %p4020_p5, %p4019_p3 }
  0x16   : > { %p4014_p13 = pnand %p4012_p12, %p4002_p11 }
  0x18   : > { %p4015_p0 = pneg %p4014_p13 }
  0x1a   : > { %p4022_p2 = pnand %p4021_p7, %p4015_p0 }
  0x1c   : > { %4025 = shalt.err (!%p4022_p2)
}
  0x1d   : > { %s4125_s25 = smov 256   ;;  %s4126_s26 = smov 16  }
  0x1e   : > { %3917 = dma.hbm_to_vmem [thread:$0]  (!%p4195_p10), %s5493_s1, 2048, %s110_s19, [#allocation6], %s4125_s25, %s4125_s25, %s4126_s26  }
  0x1f   : > { %p24_p2 = scmp.eq.s32.totalorder %s23_s23, 0  ;;  %p33_p9 = scmp.ne.s32.totalorder %s4118_s11, %s4114_s10 }
  0x20   : > { %p34_p11 = scmp.eq.s32.totalorder %s4122_s12, 0  ;;  %p3927_p12 = scmp.lt.s32.totalorder %s4122_s12, 4 }
  0x21   : > { %s4220_s29 = scalar_select %p24_p2, %s4118_s11, %s26_s22  }
  0x22   : > { %p35_p13 = por %p34_p11, %p33_p9  ;;  %p5541_p0 = scmp.eq.s32.totalorder %s4168_s13, 3 }
  0x23   : > { %s123_s3 = sand.u32 1, %s4118_s11   ;;  %s3903_s4 = sshll.u32 %s4122_s12, 10 }
  0x24   : > { %p4224_p3 = por %p5541_p0, %p33_p9  ;;  %s3857_s5 = sshll.u32 %s123_s3, 6 }
  0x25   : > { %s4233_s8 = scalar_lea.hbm %s5492_s0, %s3903_s4  ;;  %s127_s14 = scalar_lea.vmem [#allocation2], %s3857_s5 }
  0x26   : > { %s5542_s30 = scalar_select %p4224_p3, 1, 0 }
  0x27   : > { %s135_s18 = sshll.u32 %s127_s14, 4  ;;  %p4235_p10 = pnand %p3927_p12, %p35_p13  ;;  %s4239_s18 = int_to_ptr.vmem [resolvable:$true] %s135_s18 }
  0x28   : > { %s4241_s20 = scalar_lea.sflag [#allocation3], %s123_s3  ;;  %s4026_s22 = scalar_lea.hbm %s4233_s8, 1024 }
  0x29   : > { %p4027_p5 = scmp.ne.s32.totalorder %s4233_s8, %s4026_s22  ;;  %p4028_p7 = pneg %p4235_p10 }
  0x2a   : > { %s4031_s27 = scalar_lea.hbm %s5492_s0, 4096  ;;  %p4032_p11 = scmp.lt.s32.totalorder %s4233_s8, %s5492_s0 }
  0x2b   : > { %p4029_p2 = pnand %p4028_p7, %p4027_p5  ;;  %p4033_p12 = scmp.lt.s32.totalorder %s4031_s27, %s4026_s22 }
  0x2d   : > { %p4030_p9 = pneg %p4029_p2  ;;  %p4034_p13 = por %p4033_p12, %p4032_p11 }
  0x2f   : > { %p4035_p0 = pnand %p4034_p13, %p4030_p9 }
  0x31   : > { %4038 = shalt.err (!%p4035_p0)
}
  0x32   : > { %s4039_s3 = scalar_lea.vmem %s4239_s18, 1024  ;;  %s4127_s5 = smov [#allocation2]  }
  0x33   : > { %p4040_p1 = scmp.ne.s32.totalorder %s4239_s18, %s4039_s3  ;;  %s4044_s6 = sshll.u32 %s4127_s5, 4  ;;  %s4045_s6 = int_to_ptr.vmem [resolvable:$false] %s4044_s6 }
  0x34   : > { %s4046_s7 = scalar_lea.vmem %s4045_s6, 2048  ;;  %p4047_p2 = scmp.lt.s32.totalorder %s4239_s18, %s4045_s6 }
  0x35   : > { %p4042_p6 = pnand %p4040_p1, %p4028_p7  ;;  %p4048_p3 = scmp.lt.s32.totalorder %s4046_s7, %s4039_s3 }
  0x37   : > { %p4043_p5 = pneg %p4042_p6  ;;  %p4049_p4 = por %p4048_p3, %p4047_p2 }
  0x39   : > { %p4050_p8 = pnand %p4049_p4, %p4043_p5 }
  0x3b   : > { %4053 = shalt.err (!%p4050_p8)
}
  0x3c   : > { %3921 = dma.hbm_to_vmem [thread:$0]  (!%p4235_p10), %s4233_s8, 1024, %s4239_s18, %s4241_s20, %s4125_s25, %s4125_s25, %s4126_s26  }
  0x3d   : > { %p5544_p1 = scmp.ne.s32.totalorder %s5539_s17, 0 }
  0x3f   : > { %147 = sbr.rel (%p5544_p1) target bundleno = 394 (0x18a), region = 28 }
  0x44   : > { %s4268_s14 = sand.u32 1, %s4114_s10   ;;  %p5545_p4 = scmp.ne.s32.totalorder %s5537_s15, 0 }
  0x45   : > { %s3862_s22 = sshll.u32 %s4268_s14, 6  ;;  %s150_s23 = scalar_lea.sflag [#allocation3], %s4268_s14 }
  0x46   : > { %s4274_s19 = scalar_lea.vmem [#allocation2], %s3862_s22 }
  0x47   : > { %4097 = dma.done.wait (%p5545_p4), %s150_s23, 1024  }
  0x48   : > { %4099 = vsyncadd (%p5545_p4), %s150_s23, 4294966272  ;;  %p5546_p6 = scmp.eq.s32.totalorder %s4168_s13, 0 }
  0x4a   : > { %4101 = dma.done.wait (%p5546_p6), [#allocation6], 2048   ;;  %p5547_p8 = pmov %p5546_p6 }
  0x4b   : > { %v245_v0 = vlaneseq  ;;  %v4128_v1 = vmov 1966171168   ;;  %v243_v7 = vld [vmem:[#allocation5] ss:$8 sm:$0x3]  ;;  %vm3634_vm0 = vcmask 1040384  }
  0x4c   : > { %4103 = vsyncadd (%p5547_p8), [#allocation6], 4294965248  ;;  %v255_v2 = vunpack.c.l.s4 %v4128_v1  ;;  %v287_v9 = vld [vmem:[#allocation5 + $0x1] ss:$8 sm:$0x3]  ;;  %vm3643_vm1 = vcmask 1041408  }
  0x4d   : > { %v246_v3 = vshrl.u32 %v245_v0, 7  ;;  %v335_v14 = vld [vmem:[#allocation5 + $0x2] ss:$8 sm:$0x3]  ;;  %vm3652_vm2 = vcmask 1042432   ;;  %vm3661_vm3 = vcmask 1043456  }
  0x4e   : > { %v256_v4 = vunpack.c.0.s8 %v255_v2  ;;  %v383_v15 = vld [vmem:[#allocation5 + $0x3] ss:$8 sm:$0x3]  ;;  %v431_v20 = vld [vmem:[#allocation5 + $0x4] ss:$8 sm:$0x3] }
  0x4f   : > { %v4284_v5 = vsub.s32 0, %v246_v3  ;;  %v4286_v6 = vsub.s32 1, %v246_v3  ;;  %v479_v21 = vld [vmem:[#allocation5 + $0x5] ss:$8 sm:$0x3]  ;;  %vm3670_vm4 = vcmask 1044480  }
  0x50   : > { %v4288_v8 = vsub.s32 %v256_v4, %v246_v3  ;;  %v4300_v26 = vld [vmem:[#allocation5 + $0x6] ss:$8 sm:$0x3]  ;;  %v4309_v35 = vld [vmem:[%s4274_s19] ss:$8 sm:$0x3] }
  0x51   : > { %v248_v10 = vrot.slane %v243_v7, %v4284_v5  ;;  %v252_v11 = vrot.slane %v243_v7, %v4286_v6  ;;  %v292_v12 = vrot.slane %v287_v9, %v4284_v5  ;;  %v296_v13 = vrot.slane %v287_v9, %v4286_v6  ;;  %v4312_v36 = vld [vmem:[%s4274_s19 + $0x10] ss:$8 sm:$0x3]  ;;  %v4321_v41 = vld [vmem:[%s4274_s19 + $0x20] ss:$8 sm:$0x3] }
  0x52   : > { %v340_v16 = vrot.slane %v335_v14, %v4284_v5  ;;  %v344_v17 = vrot.slane %v335_v14, %v4286_v6  ;;  %v388_v18 = vrot.slane %v383_v15, %v4284_v5  ;;  %v392_v19 = vrot.slane %v383_v15, %v4286_v6  ;;  %v4324_v42 = vld [vmem:[%s4274_s19 + $0x1] ss:$8 sm:$0x3]  ;;  %v4329_v47 = vld [vmem:[%s4274_s19 + $0x30] ss:$8 sm:$0x3] }
  0x53   : > { %v253_v22 = vcombine.low %v248_v10, %v252_v11  ;;  %v297_v23 = vcombine.low %v292_v12, %v296_v13  ;;  %v436_v24 = vrot.slane %v431_v20, %v4284_v5  ;;  %v440_v25 = vrot.slane %v431_v20, %v4286_v6  ;;  %v4332_v48 = vld [vmem:[%s4274_s19 + $0x11] ss:$8 sm:$0x3]  ;;  %v4337_v53 = vld [vmem:[%s4274_s19 + $0x21] ss:$8 sm:$0x3] }
  0x54   : > { %v345_v27 = vcombine.low %v340_v16, %v344_v17  ;;  %v393_v28 = vcombine.low %v388_v18, %v392_v19  ;;  %v484_v29 = vrot.slane %v479_v21, %v4284_v5  ;;  %v488_v30 = vrot.slane %v479_v21, %v4286_v6  ;;  %5548 = vst [vmem:[#allocation11_spill] sm:$0xff] %v4337_v53  ;;  %v4340_v54 = vld [vmem:[%s4274_s19 + $0x31] ss:$8 sm:$0x3]  ;;  %s3905_s15 = sshll.u32 %s4168_s13, 10  ;;  %s5354_s17 = scalar_lea.vmem [#allocation7], %s3862_s22 }
  0x55   : > { %v260_v31 = vrot.slane %v253_v22, %v4288_v8  ;;  %v304_v32 = vrot.slane %v297_v23, %v4288_v8  ;;  %v441_v33 = vcombine.low %v436_v24, %v440_v25  ;;  %v532_v34 = vrot.slane %v4300_v26, %v4284_v5  ;;  %v4346_v59 = vld [vmem:[%s4274_s19 + $0x2] ss:$8 sm:$0x3]  ;;  %v4349_v60 = vld [vmem:[%s4274_s19 + $0x12] ss:$8 sm:$0x3]  ;;  %s5404_s8 = scalar_lea.hbm %s5494_s2, %s3905_s15 }
  0x56   : > { %v352_v37 = vrot.slane %v345_v27, %v4288_v8  ;;  %v400_v38 = vrot.slane %v393_v28, %v4288_v8  ;;  %v4316_v39 = vcombine.low %v484_v29, %v488_v30  ;;  %v536_v40 = vrot.slane %v4300_v26, %v4286_v6  ;;  %v4354_v1 = vld [vmem:[%s4274_s19 + $0x22] ss:$8 sm:$0x3]  ;;  %v4357_v2 = vld [vmem:[%s4274_s19 + $0x32] ss:$8 sm:$0x3] }
  0x57   : > { %v261_v43 = vcombine.high %v260_v31, %v260_v31  ;;  %v268_v44 = vrot.slane %v260_v31, %v4288_v8  ;;  %v305_v45 = vcombine.high %v304_v32, %v304_v32  ;;  %v312_v46 = vrot.slane %v304_v32, %v4288_v8  ;;  %v4364_v14 = vld [vmem:[%s4274_s19 + $0x3] ss:$8 sm:$0x3]  ;;  %v4371_v19 = vld [vmem:[%s4274_s19 + $0x13] ss:$8 sm:$0x3] }
  0x58   : > { %v353_v49 = vcombine.high %v352_v37, %v352_v37  ;;  %v360_v50 = vrot.slane %v352_v37, %v4288_v8  ;;  %v401_v51 = vcombine.high %v400_v38, %v400_v38  ;;  %v408_v52 = vrot.slane %v400_v38, %v4288_v8  ;;  %v4374_v20 = vld [vmem:[%s4274_s19 + $0x23] ss:$8 sm:$0x3]  ;;  %v4380_v30 = vld [vmem:[%s4274_s19 + $0x33] ss:$8 sm:$0x3] }
  0x59   : > { %v275_v55 = vrot.slane %v261_v43, %v4288_v8  ;;  %v276_v56 = vcombine.high %v268_v44, %v268_v44  ;;  %v282_v57 = vmul.f32 %v268_v44, %v4309_v35  ;;  %v319_v58 = vrot.slane %v305_v45, %v4288_v8  ;;  %v4385_v43 = vld [vmem:[%s4274_s19 + $0x4] ss:$8 sm:$0x3]  ;;  %s3721_s25 = sshll.u32 %s5354_s17, 4  ;;  %s3707_s18 = scalar_lea.sflag [#allocation4], %s4268_s14  ;;  %s5406_s25 = int_to_ptr.vmem [resolvable:$true] %s3721_s25 }
  0x5a   : > { %v320_v61 = vcombine.high %v312_v46, %v312_v46  ;;  %v326_v62 = vmul.f32 %v4324_v42, %v312_v46  ;;  %v367_v63 = vrot.slane %v353_v49, %v4288_v8  ;;  %v368_v0 = vcombine.high %v360_v50, %v360_v50  ;;  %s4054_s20 = scalar_lea.vmem %s5406_s25, 1024  ;;  %p5635_p10 = scmp.ne.s32.totalorder %s5542_s30, 0 }
  0x5b   : > { %v277_v3 = vcombine.high %v275_v55, %v275_v55  ;;  %v283_v4 = vmul.f32 %v4312_v36, %v275_v55  ;;  %v284_v7 = vmul.f32 %v4321_v41, %v276_v56  ;;  %v321_v9 = vcombine.high %v319_v58, %v319_v58  ;;  %p4055_p3 = scmp.ne.s32.totalorder %s5406_s25, %s4054_s20  ;;  %s4129_s24 = smov [#allocation7]  }
  0x5c   : > { %v327_v10 = vmul.f32 %v4332_v48, %v319_v58  ;;  %v328_v11 = vmul.f32 %v4337_v53, %v320_v61  ;;  %v330_v12 = vadd.f32 %v326_v62, %v282_v57  ;;  %v369_v13 = vcombine.high %v367_v63, %v367_v63  ;;  %v4393_v57 = vld [vmem:[%s4274_s19 + $0x14] ss:$8 sm:$0x3]  ;;  %s4058_s27 = sshll.u32 %s4129_s24, 4  ;;  %s4059_s27 = int_to_ptr.vmem [resolvable:$false] %s4058_s27 }
  0x5d   : > { %v285_v15 = vmul.f32 %v4329_v47, %v277_v3  ;;  %v329_v16 = vmul.f32 %v4340_v54, %v321_v9  ;;  %v374_v17 = vmul.f32 %v4346_v59, %v360_v50  ;;  %v375_v18 = vmul.f32 %v4349_v60, %v367_v63  ;;  %v4411_v9 = vld [vmem:[%s4274_s19 + $0x34] ss:$8 sm:$0x3]  ;;  %p4056_p7 = pnand %p4055_p3, %p5635_p10  ;;  %s4060_s28 = scalar_lea.vmem %s4059_s27, 2048 }
  0x5e   : > { %v331_v21 = vadd.f32 %v327_v10, %v283_v4  ;;  %v332_v22 = vadd.f32 %v328_v11, %v284_v7  ;;  %v376_v23 = vmul.f32 %v4354_v1, %v368_v0  ;;  %v377_v24 = vmul.f32 %v4357_v2, %v369_v13  ;;  %v4406_v0 = vld [vmem:[%s4274_s19 + $0x5] ss:$8 sm:$0x3]  ;;  %p4061_p11 = scmp.lt.s32.totalorder %s5406_s25, %s4059_s27  ;;  %p4062_p12 = scmp.lt.s32.totalorder %s4060_s28, %s4054_s20 }
  0x5f   : > { %v333_v25 = vadd.f32 %v329_v16, %v285_v15  ;;  %v378_v27 = vadd.f32 %v374_v17, %v330_v12  ;;  %v415_v28 = vrot.slane %v401_v51, %v4288_v8  ;;  %v416_v29 = vcombine.high %v408_v52, %v408_v52  ;;  %p4057_p9 = pneg %p4056_p7 }
  0x60   : > { %v379_v31 = vadd.f32 %v375_v18, %v331_v21  ;;  %v380_v32 = vadd.f32 %v376_v23, %v332_v22  ;;  %v422_v37 = vmul.f32 %v4364_v14, %v408_v52  ;;  %v448_v38 = vrot.slane %v441_v33, %v4288_v8  ;;  %v575_v52 = vld [vmem:[#allocation5 + $0x7] ss:$8 sm:$0x3]  ;;  %v4396_v33 = vld [vmem:[%s4274_s19 + $0x24] ss:$8 sm:$0x3]  ;;  %p4063_p13 = por %p4062_p12, %p4061_p11 }
  0x61   : > { %v381_v44 = vadd.f32 %v377_v24, %v333_v25  ;;  %v417_v45 = vcombine.high %v415_v28, %v415_v28  ;;  %v423_v46 = vmul.f32 %v4371_v19, %v415_v28  ;;  %v424_v49 = vmul.f32 %v4374_v20, %v416_v29  ;;  %v4425_v18 = vld [vmem:[%s4274_s19 + $0x6] ss:$8 sm:$0x3]  ;;  %v4430_v25 = vld [vmem:[%s4274_s19 + $0x35] ss:$8 sm:$0x3] }
  0x62   : > { %v426_v50 = vadd.f32 %v422_v37, %v378_v27  ;;  %v449_v51 = vcombine.high %v448_v38, %v448_v38  ;;  %v456_v55 = vrot.slane %v448_v38, %v4288_v8  ;;  %v496_v56 = vrot.slane %v4316_v39, %v4288_v8  ;;  %5549 = vst [vmem:[#allocation12_spill] sm:$0xff] %v4425_v18  ;;  %v4438_v37 = vld [vmem:[%s4274_s19 + $0x26] ss:$8 sm:$0x3]  ;;  %p4064_p0 = pnand %p4063_p13, %p4057_p9 }
  0x63   : > { %v425_v58 = vmul.f32 %v4380_v30, %v417_v45  ;;  %v427_v61 = vadd.f32 %v423_v46, %v379_v31  ;;  %v428_v62 = vadd.f32 %v424_v49, %v380_v32  ;;  %v537_v63 = vcombine.low %v532_v34, %v536_v40  ;;  %v4417_v34 = vld [vmem:[%s4274_s19 + $0x15] ss:$8 sm:$0x3]  ;;  %v4420_v40 = vld [vmem:[%s4274_s19 + $0x25] ss:$8 sm:$0x3] }
  0x64   : > { %v463_v39 = vrot.slane %v449_v51, %v4288_v8  ;;  %v464_v3 = vcombine.high %v456_v55, %v456_v55  ;;  %v470_v4 = vmul.f32 %v4385_v43, %v456_v55  ;;  %v497_v7 = vcombine.high %v496_v56, %v496_v56  ;;  %v4435_v32 = vld [vmem:[%s4274_s19 + $0x16] ss:$8 sm:$0x3]  ;;  %5550 = vst [vmem:[#allocation13_spill] sm:$0xff] %v4438_v37 }
  0x65   : > { %v429_v10 = vadd.f32 %v425_v58, %v381_v44  ;;  %v504_v11 = vrot.slane %v496_v56, %v4288_v8  ;;  %v544_v12 = vrot.slane %v537_v63, %v4288_v8  ;;  %v580_v26 = vrot.slane %v575_v52, %v4284_v5  ;;  %v623_v56 = vld [vmem:[#allocation5 + $0x10] ss:$8 sm:$0x3]  ;;  %v4445_v58 = vld [vmem:[%s4274_s19 + $0x36] ss:$8 sm:$0x3] }
  0x66   : > { %v465_v13 = vcombine.high %v463_v39, %v463_v39  ;;  %v471_v15 = vmul.f32 %v4393_v57, %v463_v39  ;;  %v472_v16 = vmul.f32 %v4396_v33, %v464_v3  ;;  %v474_v17 = vadd.f32 %v470_v4, %v426_v50  ;;  %v667_v3 = vld [vmem:[#allocation5 + $0x11] ss:$8 sm:$0x3] }
  0x67   : > { %v511_v21 = vrot.slane %v497_v7, %v4288_v8  ;;  %v512_v22 = vcombine.high %v504_v11, %v504_v11  ;;  %v518_v23 = vmul.f32 %v4406_v0, %v504_v11  ;;  %v545_v24 = vcombine.high %v544_v12, %v544_v12 }
  0x68   : > { %v473_v27 = vmul.f32 %v4411_v9, %v465_v13  ;;  %v475_v28 = vadd.f32 %v471_v15, %v427_v61  ;;  %v476_v29 = vadd.f32 %v472_v16, %v428_v62  ;;  %v552_v31 = vrot.slane %v544_v12, %v4288_v8  ;;  %v715_v12 = vld [vmem:[#allocation5 + $0x12] ss:$8 sm:$0x3] }
  0x69   : > { %v513_v38 = vcombine.high %v511_v21, %v511_v21  ;;  %v519_v44 = vmul.f32 %v4417_v34, %v511_v21  ;;  %v520_v45 = vmul.f32 %v4420_v40, %v512_v22  ;;  %v522_v46 = vadd.f32 %v518_v23, %v474_v17  ;;  %v763_v21 = vld [vmem:[#allocation5 + $0x13] ss:$8 sm:$0x3] }
  0x6a   : > { %v477_v49 = vadd.f32 %v473_v27, %v429_v10  ;;  %v559_v50 = vrot.slane %v545_v24, %v4288_v8  ;;  %v560_v51 = vcombine.high %v552_v31, %v552_v31  ;;  %v566_v55 = vmul.f32 %v4425_v18, %v552_v31  ;;  %v4458_v31 = vld [vmem:[#allocation5 + $0x14] ss:$8 sm:$0x3] }
  0x6b   : > { %v521_v61 = vmul.f32 %v4430_v25, %v513_v38  ;;  %v523_v62 = vadd.f32 %v519_v44, %v475_v28  ;;  %v524_v63 = vadd.f32 %v520_v45, %v476_v29  ;;  %v584_v39 = vrot.slane %v575_v52, %v4286_v6  ;;  %v4461_v38 = vld [vmem:[%s4274_s19 + $0x7] ss:$8 sm:$0x3] }
  0x6c   : > { %v561_v4 = vcombine.high %v559_v50, %v559_v50  ;;  %v567_v7 = vmul.f32 %v4435_v32, %v559_v50  ;;  %v568_v10 = vmul.f32 %v4438_v37, %v560_v51  ;;  %v570_v11 = vadd.f32 %v566_v55, %v522_v46 }
  0x6d   : > { %v525_v13 = vadd.f32 %v521_v61, %v477_v49  ;;  %v585_v15 = vcombine.low %v580_v26, %v584_v39  ;;  %v628_v16 = vrot.slane %v623_v56, %v4284_v5  ;;  %v632_v17 = vrot.slane %v623_v56, %v4286_v6  ;;  %v4469_v61 = vld [vmem:[%s4274_s19 + $0x17] ss:$8 sm:$0x3] }
  0x6e   : > { %v569_v22 = vmul.f32 %v4445_v58, %v561_v4  ;;  %v571_v23 = vadd.f32 %v567_v7, %v523_v62  ;;  %v572_v52 = vadd.f32 %v568_v10, %v524_v63  ;;  %v672_v24 = vrot.slane %v667_v3, %v4284_v5  ;;  %v4472_v62 = vld [vmem:[%s4274_s19 + $0x27] ss:$8 sm:$0x3] }
  0x6f   : > { %v592_v27 = vrot.slane %v585_v15, %v4288_v8  ;;  %v633_v28 = vcombine.low %v628_v16, %v632_v17  ;;  %v676_v29 = vrot.slane %v667_v3, %v4286_v6  ;;  %v720_v26 = vrot.slane %v715_v12, %v4284_v5  ;;  %v4481_v15 = vld [vmem:[%s4274_s19 + $0x37] ss:$8 sm:$0x3] }
  0x70   : > { %v573_v44 = vadd.f32 %v569_v22, %v525_v13  ;;  %v724_v45 = vrot.slane %v715_v12, %v4286_v6  ;;  %v768_v46 = vrot.slane %v763_v21, %v4284_v5  ;;  %v772_v49 = vrot.slane %v763_v21, %v4286_v6 }
  0x71   : > { %v593_v50 = vcombine.high %v592_v27, %v592_v27  ;;  %v600_v51 = vrot.slane %v592_v27, %v4288_v8  ;;  %v640_v55 = vrot.slane %v633_v28, %v4288_v8  ;;  %v677_v56 = vcombine.low %v672_v24, %v676_v29 }
  0x72   : > { %v725_v63 = vcombine.low %v720_v26, %v724_v45  ;;  %v773_v39 = vcombine.low %v768_v46, %v772_v49  ;;  %v816_v3 = vrot.slane %v4458_v31, %v4284_v5  ;;  %v820_v4 = vrot.slane %v4458_v31, %v4286_v6 }
  0x73   : > { %v607_v7 = vrot.slane %v593_v50, %v4288_v8  ;;  %v608_v10 = vcombine.high %v600_v51, %v600_v51  ;;  %v614_v12 = vmul.f32 %v4461_v38, %v600_v51  ;;  %v641_v13 = vcombine.high %v640_v55, %v640_v55 }
  0x74   : > { %v648_v16 = vrot.slane %v640_v55, %v4288_v8  ;;  %v684_v17 = vrot.slane %v677_v56, %v4288_v8  ;;  %v732_v21 = vrot.slane %v725_v63, %v4288_v8  ;;  %v780_v22 = vrot.slane %v773_v39, %v4288_v8 }
  0x75   : > { %v609_v24 = vcombine.high %v607_v7, %v607_v7  ;;  %v615_v27 = vmul.f32 %v4469_v61, %v607_v7  ;;  %v616_v28 = vmul.f32 %v4472_v62, %v608_v10  ;;  %v4489_v29 = vadd.f32 %v614_v12, %v570_v11 }
  0x76   : > { %v655_v26 = vrot.slane %v641_v13, %v4288_v8  ;;  %v656_v31 = vcombine.high %v648_v16, %v648_v16  ;;  %v662_v45 = vmul.f32 %v648_v16, %v4309_v35  ;;  %v685_v46 = vcombine.high %v684_v17, %v684_v17 }
  0x77   : > { %5551 = vst [vmem:[#allocation14_spill] sm:$0xff] %v4489_v29  ;;  %v617_v49 = vmul.f32 %v4481_v15, %v609_v24  ;;  %v4494_v50 = vadd.f32 %v615_v27, %v571_v23  ;;  %v4496_v51 = vadd.f32 %v616_v28, %v572_v52  ;;  %v692_v55 = vrot.slane %v684_v17, %v4288_v8 }
  0x78   : > { %v657_v56 = vcombine.high %v655_v26, %v655_v26  ;;  %v663_v63 = vmul.f32 %v4312_v36, %v655_v26  ;;  %v664_v11 = vmul.f32 %v4321_v41, %v656_v31  ;;  %v699_v39 = vrot.slane %v685_v46, %v4288_v8 }
  0x79   : > { %5552 = vst [vmem:[#allocation15_spill] sm:$0xff] %v4494_v50  ;;  %5553 = vst [vmem:[#allocation16_spill] sm:$0xff] %v4496_v51  ;;  %v4502_v7 = vadd.f32 %v617_v49, %v573_v44  ;;  %v700_v10 = vcombine.high %v692_v55, %v692_v55  ;;  %v706_v12 = vmul.f32 %v4324_v42, %v692_v55  ;;  %v907_v50 = vld [vmem:[#allocation5 + $0x16] ss:$8 sm:$0x3]  ;;  %vm3679_vm5 = vcmask 1045504  }
  0x7a   : > { %v733_v13 = vcombine.high %v732_v21, %v732_v21  ;;  %v665_v23 = vmul.f32 %v4329_v47, %v657_v56  ;;  %v701_v16 = vcombine.high %v699_v39, %v699_v39  ;;  %v707_v52 = vmul.f32 %v4332_v48, %v699_v39 }
  0x7b   : > { %5554 = vst [vmem:[#allocation17_spill] sm:$0xff] %v4502_v7  ;;  %v740_v17 = vrot.slane %v732_v21, %v4288_v8  ;;  %v708_v24 = vmul.f32 %v4337_v53, %v700_v10  ;;  %v710_v27 = vadd.f32 %v706_v12, %v662_v45  ;;  %v781_v26 = vcombine.high %v780_v22, %v780_v22  ;;  %v859_v12 = vld [vmem:[#allocation5 + $0x15] ss:$8 sm:$0x3] }
  0x7c   : > { %v747_v28 = vrot.slane %v733_v13, %v4288_v8  ;;  %v709_v44 = vmul.f32 %v4340_v54, %v701_v16  ;;  %v711_v31 = vadd.f32 %v707_v52, %v663_v63  ;;  %v788_v39 = vrot.slane %v780_v22, %v4288_v8  ;;  %v955_v22 = vld [vmem:[#allocation5 + $0x17] ss:$8 sm:$0x3] }
  0x7d   : > { %v748_v46 = vcombine.high %v740_v17, %v740_v17  ;;  %v754_v49 = vmul.f32 %v4346_v59, %v740_v17  ;;  %v712_v55 = vadd.f32 %v708_v24, %v664_v11  ;;  %v795_v45 = vrot.slane %v781_v26, %v4288_v8 }
  0x7e   : > { %v749_v7 = vcombine.high %v747_v28, %v747_v28  ;;  %v755_v56 = vmul.f32 %v4349_v60, %v747_v28  ;;  %v713_v51 = vadd.f32 %v709_v44, %v665_v23  ;;  %v796_v63 = vcombine.high %v788_v39, %v788_v39 }
  0x7f   : > { %v756_v21 = vmul.f32 %v4354_v1, %v748_v46  ;;  %v758_v10 = vadd.f32 %v754_v49, %v710_v27  ;;  %v802_v52 = vmul.f32 %v4364_v14, %v788_v39  ;;  %v797_v11 = vcombine.high %v795_v45, %v795_v45 }
  0x80   : > { %v757_v13 = vmul.f32 %v4357_v2, %v749_v7  ;;  %v759_v16 = vadd.f32 %v755_v56, %v711_v31  ;;  %v803_v24 = vmul.f32 %v4371_v19, %v795_v45  ;;  %v821_v28 = vcombine.low %v816_v3, %v820_v4 }
  0x81   : > { %v760_v17 = vadd.f32 %v756_v21, %v712_v55  ;;  %v804_v44 = vmul.f32 %v4374_v20, %v796_v63  ;;  %v806_v27 = vadd.f32 %v802_v52, %v758_v10  ;;  %v864_v26 = vrot.slane %v859_v12, %v4284_v5  ;;  %v1003_v55 = vld [vmem:[#allocation5 + $0x20] ss:$8 sm:$0x3] }
  0x82   : > { %v761_v23 = vadd.f32 %v757_v13, %v713_v51  ;;  %v805_v46 = vmul.f32 %v4380_v30, %v797_v11  ;;  %v807_v7 = vadd.f32 %v803_v24, %v759_v16  ;;  %v828_v31 = vrot.slane %v821_v28, %v4288_v8  ;;  %v4528_v13 = vld [vmem:[#allocation5 + $0x21] ss:$8 sm:$0x3] }
  0x83   : > { %v868_v49 = vrot.slane %v859_v12, %v4286_v6  ;;  %v808_v56 = vadd.f32 %v804_v44, %v760_v17  ;;  %v912_v39 = vrot.slane %v907_v50, %v4284_v5  ;;  %v916_v3 = vrot.slane %v907_v50, %v4286_v6 }
  0x84   : > { %v960_v4 = vrot.slane %v955_v22, %v4284_v5  ;;  %v809_v51 = vadd.f32 %v805_v46, %v761_v23  ;;  %v829_v21 = vcombine.high %v828_v31, %v828_v31  ;;  %v836_v10 = vrot.slane %v828_v31, %v4288_v8 }
  0x85   : > { %v869_v45 = vcombine.low %v864_v26, %v868_v49  ;;  %v917_v16 = vcombine.low %v912_v39, %v916_v3  ;;  %v964_v63 = vrot.slane %v955_v22, %v4286_v6  ;;  %v1008_v12 = vrot.slane %v1003_v55, %v4284_v5 }
  0x86   : > { %v1012_v52 = vrot.slane %v1003_v55, %v4286_v6  ;;  %v843_v17 = vrot.slane %v829_v21, %v4288_v8  ;;  %v844_v11 = vcombine.high %v836_v10, %v836_v10  ;;  %v850_v50 = vmul.f32 %v4385_v43, %v836_v10 }
  0x87   : > { %v876_v24 = vrot.slane %v869_v45, %v4288_v8  ;;  %v924_v28 = vrot.slane %v917_v16, %v4288_v8  ;;  %v965_v23 = vcombine.low %v960_v4, %v964_v63  ;;  %v1052_v26 = vrot.slane %v4528_v13, %v4284_v5 }
  0x88   : > { %v1013_v44 = vcombine.low %v1008_v12, %v1012_v52  ;;  %v845_v46 = vcombine.high %v843_v17, %v843_v17  ;;  %v851_v22 = vmul.f32 %v4393_v57, %v843_v17  ;;  %v852_v31 = vmul.f32 %v4396_v33, %v844_v11 }
  0x89   : > { %v854_v49 = vadd.f32 %v850_v50, %v806_v27  ;;  %v877_v55 = vcombine.high %v876_v24, %v876_v24  ;;  %v884_v39 = vrot.slane %v876_v24, %v4288_v8  ;;  %v925_v3 = vcombine.high %v924_v28, %v924_v28 }
  0x8a   : > { %v932_v21 = vrot.slane %v924_v28, %v4288_v8  ;;  %v853_v10 = vmul.f32 %v4411_v9, %v845_v46  ;;  %v855_v45 = vadd.f32 %v851_v22, %v807_v7  ;;  %v856_v4 = vadd.f32 %v852_v31, %v808_v56 }
  0x8b   : > { %v972_v16 = vrot.slane %v965_v23, %v4288_v8  ;;  %v891_v63 = vrot.slane %v877_v55, %v4288_v8  ;;  %v892_v12 = vcombine.high %v884_v39, %v884_v39  ;;  %v898_v52 = vmul.f32 %v4406_v0, %v884_v39 }
  0x8c   : > { %v939_v17 = vrot.slane %v925_v3, %v4288_v8  ;;  %v857_v27 = vadd.f32 %v853_v10, %v809_v51  ;;  %v940_v11 = vcombine.high %v932_v21, %v932_v21  ;;  %v946_v50 = vmul.f32 %v4425_v18, %v932_v21 }
  0x8d   : > { %v973_v24 = vcombine.high %v972_v16, %v972_v16  ;;  %v893_v29 = vcombine.high %v891_v63, %v891_v63  ;;  %v899_v28 = vmul.f32 %v4417_v34, %v891_v63  ;;  %v900_v7 = vmul.f32 %v4420_v40, %v892_v12 }
  0x8e   : > { %v902_v56 = vadd.f32 %v898_v52, %v854_v49  ;;  %v941_v46 = vcombine.high %v939_v17, %v939_v17  ;;  %v947_v23 = vmul.f32 %v4435_v32, %v939_v17  ;;  %v948_v22 = vmul.f32 %v4438_v37, %v940_v11  ;;  %v1095_v11 = vld [vmem:[#allocation5 + $0x22] ss:$8 sm:$0x3] }
  0x8f   : > { %v980_v31 = vrot.slane %v972_v16, %v4288_v8  ;;  %v901_v55 = vmul.f32 %v4430_v25, %v893_v29  ;;  %v903_v51 = vadd.f32 %v899_v28, %v855_v45  ;;  %v904_v39 = vadd.f32 %v900_v7, %v856_v4 }
  0x90   : > { %v950_v3 = vadd.f32 %v946_v50, %v902_v56  ;;  %v949_v21 = vmul.f32 %v4445_v58, %v941_v46  ;;  %v987_v10 = vrot.slane %v973_v24, %v4288_v8  ;;  %v1020_v17 = vrot.slane %v1013_v44, %v4288_v8 }
  0x91   : > { %v988_v63 = vcombine.high %v980_v31, %v980_v31  ;;  %v994_v12 = vmul.f32 %v4461_v38, %v980_v31  ;;  %v905_v49 = vadd.f32 %v901_v55, %v857_v27  ;;  %v951_v52 = vadd.f32 %v947_v23, %v903_v51  ;;  %v1143_v27 = vld [vmem:[#allocation5 + $0x23] ss:$8 sm:$0x3]  ;;  %v1191_v51 = vld [vmem:[#allocation5 + $0x24] ss:$8 sm:$0x3] }
  0x92   : > { %v952_v18 = vadd.f32 %v948_v22, %v904_v39  ;;  %v989_v37 = vcombine.high %v987_v10, %v987_v10  ;;  %v995_v16 = vmul.f32 %v4469_v61, %v987_v10  ;;  %v1021_v50 = vcombine.high %v1020_v17, %v1020_v17 }
  0x93   : > { %v996_v29 = vmul.f32 %v4472_v62, %v988_v63  ;;  %v4561_v45 = vadd.f32 %v994_v12, %v950_v3  ;;  %v953_v4 = vadd.f32 %v949_v21, %v905_v49  ;;  %v1028_v24 = vrot.slane %v1020_v17, %v4288_v8  ;;  %v1239_v21 = vld [vmem:[#allocation5 + $0x25] ss:$8 sm:$0x3] }
  0x94   : > { %v1056_v28 = vrot.slane %v4528_v13, %v4286_v6  ;;  %v997_v7 = vmul.f32 %v4481_v15, %v989_v37  ;;  %v4567_v56 = vadd.f32 %v995_v16, %v951_v52  ;;  %v1100_v46 = vrot.slane %v1095_v11, %v4284_v5  ;;  %v1287_v16 = vld [vmem:[#allocation5 + $0x26] ss:$8 sm:$0x3] }
  0x95   : > { %5555 = vst [vmem:[#allocation18_spill] sm:$0xff] %v4561_v45  ;;  %v4569_v44 = vadd.f32 %v996_v29, %v952_v18  ;;  %v1035_v23 = vrot.slane %v1021_v50, %v4288_v8  ;;  %v1036_v22 = vcombine.high %v1028_v24, %v1028_v24  ;;  %v1042_v31 = vmul.f32 %v1028_v24, %v4309_v35 }
  0x96   : > { %5556 = vst [vmem:[#allocation19_spill] sm:$0xff] %v4567_v56  ;;  %v1057_v55 = vcombine.low %v1052_v26, %v1056_v28  ;;  %v4574_v39 = vadd.f32 %v997_v7, %v953_v4  ;;  %v1104_v13 = vrot.slane %v1095_v11, %v4286_v6  ;;  %v1148_v3 = vrot.slane %v1143_v27, %v4284_v5 }
  0x97   : > { %5557 = vst [vmem:[#allocation20_spill] sm:$0xff] %v4569_v44  ;;  %v1152_v37 = vrot.slane %v1143_v27, %v4286_v6  ;;  %v1037_v18 = vcombine.high %v1035_v23, %v1035_v23  ;;  %v1043_v10 = vmul.f32 %v4312_v36, %v1035_v23  ;;  %v1044_v63 = vmul.f32 %v4321_v41, %v1036_v22 }
  0x98   : > { %5558 = vst [vmem:[#allocation21_spill] sm:$0xff] %v4574_v39  ;;  %v1064_v12 = vrot.slane %v1057_v55, %v4288_v8  ;;  %v1105_v49 = vcombine.low %v1100_v46, %v1104_v13  ;;  %v1196_v26 = vrot.slane %v1191_v51, %v4284_v5  ;;  %v1200_v17 = vrot.slane %v1191_v51, %v4286_v6 }
  0x99   : > { %v1153_v52 = vcombine.low %v1148_v3, %v1152_v37  ;;  %v1045_v11 = vmul.f32 %v4329_v47, %v1037_v18  ;;  %v1244_v50 = vrot.slane %v1239_v21, %v4284_v5  ;;  %v1248_v7 = vrot.slane %v1239_v21, %v4286_v6 }
  0x9a   : > { %v1065_v29 = vcombine.high %v1064_v12, %v1064_v12  ;;  %v1072_v4 = vrot.slane %v1064_v12, %v4288_v8  ;;  %v1112_v24 = vrot.slane %v1105_v49, %v4288_v8  ;;  %v1201_v27 = vcombine.low %v1196_v26, %v1200_v17 }
  0x9b   : > { %v1160_v28 = vrot.slane %v1153_v52, %v4288_v8  ;;  %v1292_v55 = vrot.slane %v1287_v16, %v4284_v5  ;;  %vm3688_vm6 = vcmask 1046528   ;;  %vm3698_vm7 = vcmask 261120  }
  0x9c   : > { %v1079_v46 = vrot.slane %v1065_v29, %v4288_v8  ;;  %v1080_v23 = vcombine.high %v1072_v4, %v1072_v4  ;;  %v1086_v22 = vmul.f32 %v4324_v42, %v1072_v4  ;;  %v1113_v51 = vcombine.high %v1112_v24, %v1112_v24 }
  0x9d   : > { %v1120_v13 = vrot.slane %v1112_v24, %v4288_v8  ;;  %v1161_v3 = vcombine.high %v1160_v28, %v1160_v28  ;;  %v1168_v37 = vrot.slane %v1160_v28, %v4288_v8 }
  0x9e   : > { %v1081_v18 = vcombine.high %v1079_v46, %v1079_v46  ;;  %v1087_v12 = vmul.f32 %v4332_v48, %v1079_v46  ;;  %v1088_v49 = vmul.f32 %v4337_v53, %v1080_v23  ;;  %v1090_v52 = vadd.f32 %v1086_v22, %v1042_v31 }
  0x9f   : > { %v1127_v21 = vrot.slane %v1113_v51, %v4288_v8  ;;  %v1128_v26 = vcombine.high %v1120_v13, %v1120_v13  ;;  %v1134_v17 = vmul.f32 %v4346_v59, %v1120_v13  ;;  %v1175_v29 = vrot.slane %v1161_v3, %v4288_v8 }
  0xa0   : > { %v1089_v4 = vmul.f32 %v4340_v54, %v1081_v18  ;;  %v1091_v39 = vadd.f32 %v1087_v12, %v1043_v10  ;;  %v1092_v24 = vadd.f32 %v1088_v49, %v1044_v63  ;;  %v1176_v44 = vcombine.high %v1168_v37, %v1168_v37  ;;  %v1335_v63 = vld [vmem:[#allocation5 + $0x27] ss:$8 sm:$0x3] }
  0xa1   : > { %v1129_v56 = vcombine.high %v1127_v21, %v1127_v21  ;;  %v1135_v28 = vmul.f32 %v4349_v60, %v1127_v21  ;;  %v1136_v46 = vmul.f32 %v4354_v1, %v1128_v26  ;;  %v1138_v45 = vadd.f32 %v1134_v17, %v1090_v52  ;;  %v1383_v52 = vld [vmem:[#allocation5 + $0x30] ss:$8 sm:$0x3] }
  0xa2   : > { %v1093_v23 = vadd.f32 %v1089_v4, %v1045_v11  ;;  %v1177_v31 = vcombine.high %v1175_v29, %v1175_v29  ;;  %v1182_v22 = vmul.f32 %v4364_v14, %v1168_v37  ;;  %v1183_v51 = vmul.f32 %v4371_v19, %v1175_v29 }
  0xa3   : > { %v1137_v13 = vmul.f32 %v4357_v2, %v1129_v56  ;;  %v1139_v3 = vadd.f32 %v1135_v28, %v1091_v39  ;;  %v1140_v53 = vadd.f32 %v1136_v46, %v1092_v24  ;;  %v1184_v10 = vmul.f32 %v4374_v20, %v1176_v44 }
  0xa4   : > { %v1185_v18 = vmul.f32 %v4380_v30, %v1177_v31  ;;  %v1186_v12 = vadd.f32 %v1182_v22, %v1138_v45  ;;  %v1208_v49 = vrot.slane %v1201_v27, %v4288_v8  ;;  %v1249_v21 = vcombine.low %v1244_v50, %v1248_v7 }
  0xa5   : > { %v1141_v11 = vadd.f32 %v1137_v13, %v1093_v23  ;;  %v1187_v26 = vadd.f32 %v1183_v51, %v1139_v3  ;;  %v1188_v17 = vadd.f32 %v1184_v10, %v1140_v53  ;;  %v1296_v37 = vrot.slane %v1287_v16, %v4286_v6 }
  0xa6   : > { %v1209_v29 = vcombine.high %v1208_v49, %v1208_v49  ;;  %v1216_v56 = vrot.slane %v1208_v49, %v4288_v8  ;;  %v1256_v39 = vrot.slane %v1249_v21, %v4288_v8  ;;  %v1340_v44 = vrot.slane %v1335_v63, %v4284_v5 }
  0xa7   : > { %v1189_v4 = vadd.f32 %v1185_v18, %v1141_v11  ;;  %v1297_v24 = vcombine.low %v1292_v55, %v1296_v37  ;;  %v1344_v45 = vrot.slane %v1335_v63, %v4286_v6  ;;  %v1388_v27 = vrot.slane %v1383_v52, %v4284_v5 }
  0xa8   : > { %v1223_v50 = vrot.slane %v1209_v29, %v4288_v8  ;;  %v1224_v7 = vcombine.high %v1216_v56, %v1216_v56  ;;  %v1230_v53 = vmul.f32 %v4385_v43, %v1216_v56  ;;  %v1257_v28 = vcombine.high %v1256_v39, %v1256_v39 }
  0xa9   : > { %v1264_v16 = vrot.slane %v1256_v39, %v4288_v8  ;;  %v1304_v46 = vrot.slane %v1297_v24, %v4288_v8  ;;  %v1345_v23 = vcombine.low %v1340_v44, %v1344_v45  ;;  %v1392_v31 = vrot.slane %v1383_v52, %v4286_v6  ;;  %v5559_v45 = vld [vmem:[#allocation12_spill] sm:$0xff] }
  0xaa   : > { %v1225_v22 = vcombine.high %v1223_v50, %v1223_v50  ;;  %v1231_v55 = vmul.f32 %v4393_v57, %v1223_v50  ;;  %v1232_v51 = vmul.f32 %v4396_v33, %v1224_v7  ;;  %v1234_v13 = vadd.f32 %v1230_v53, %v1186_v12 }
  0xab   : > { %v1271_v3 = vrot.slane %v1257_v28, %v4288_v8  ;;  %v1272_v10 = vcombine.high %v1264_v16, %v1264_v16  ;;  %v1278_v63 = vmul.f32 %v4406_v0, %v1264_v16  ;;  %v1305_v18 = vcombine.high %v1304_v46, %v1304_v46 }
  0xac   : > { %v1233_v49 = vmul.f32 %v4411_v9, %v1225_v22  ;;  %v1235_v21 = vadd.f32 %v1231_v55, %v1187_v26  ;;  %v1236_v11 = vadd.f32 %v1232_v51, %v1188_v17  ;;  %v1312_v37 = vrot.slane %v1304_v46, %v4288_v8  ;;  %v1427_v17 = vld [vmem:[#allocation5 + $0x31] ss:$8 sm:$0x3] }
  0xad   : > { %v1273_v29 = vcombine.high %v1271_v3, %v1271_v3  ;;  %v1279_v52 = vmul.f32 %v4417_v34, %v1271_v3  ;;  %v1280_v56 = vmul.f32 %v4420_v40, %v1272_v10  ;;  %v1282_v39 = vadd.f32 %v1278_v63, %v1234_v13  ;;  %v5560_v22 = vld [vmem:[#allocation13_spill] sm:$0xff] }
  0xae   : > { %v1237_v44 = vadd.f32 %v1233_v49, %v1189_v4  ;;  %v1319_v12 = vrot.slane %v1305_v18, %v4288_v8  ;;  %v1320_v24 = vcombine.high %v1312_v37, %v1312_v37  ;;  %v1326_v50 = vmul.f32 %v5559_v45, %v1312_v37  ;;  %v1475_v63 = vld [vmem:[#allocation5 + $0x32] ss:$8 sm:$0x3] }
  0xaf   : > { %v1281_v7 = vmul.f32 %v4430_v25, %v1273_v29  ;;  %v1283_v53 = vadd.f32 %v1279_v52, %v1235_v21  ;;  %v1284_v28 = vadd.f32 %v1280_v56, %v1236_v11  ;;  %v1352_v26 = vrot.slane %v1345_v23, %v4288_v8 }
  0xb0   : > { %v1321_v16 = vcombine.high %v1319_v12, %v1319_v12  ;;  %v1327_v46 = vmul.f32 %v4435_v32, %v1319_v12  ;;  %v1328_v55 = vmul.f32 %v5560_v22, %v1320_v24  ;;  %v1330_v51 = vadd.f32 %v1326_v50, %v1282_v39 }
  0xb1   : > { %v1285_v13 = vadd.f32 %v1281_v7, %v1237_v44  ;;  %v1353_v4 = vcombine.high %v1352_v26, %v1352_v26  ;;  %v1360_v3 = vrot.slane %v1352_v26, %v4288_v8  ;;  %v1393_v10 = vcombine.low %v1388_v27, %v1392_v31  ;;  %v1523_v31 = vld [vmem:[#allocation5 + $0x33] ss:$8 sm:$0x3] }
  0xb2   : > { %v1329_v18 = vmul.f32 %v4445_v58, %v1321_v16  ;;  %v1331_v49 = vadd.f32 %v1327_v46, %v1283_v53  ;;  %v1332_v21 = vadd.f32 %v1328_v55, %v1284_v28  ;;  %v1432_v11 = vrot.slane %v1427_v17, %v4284_v5  ;;  %v1571_v46 = vld [vmem:[#allocation5 + $0x34] ss:$8 sm:$0x3] }
  0xb3   : > { %v1367_v23 = vrot.slane %v1353_v4, %v4288_v8  ;;  %v1368_v37 = vcombine.high %v1360_v3, %v1360_v3  ;;  %v1374_v29 = vmul.f32 %v4461_v38, %v1360_v3  ;;  %v1400_v52 = vrot.slane %v1393_v10, %v4288_v8 }
  0xb4   : > { %v1333_v56 = vadd.f32 %v1329_v18, %v1285_v13  ;;  %v1436_v39 = vrot.slane %v1427_v17, %v4286_v6  ;;  %v1480_v44 = vrot.slane %v1475_v63, %v4284_v5  ;;  %v1484_v27 = vrot.slane %v1475_v63, %v4286_v6 }
  0xb5   : > { %v1369_v12 = vcombine.high %v1367_v23, %v1367_v23  ;;  %v1375_v24 = vmul.f32 %v4469_v61, %v1367_v23  ;;  %v1376_v50 = vmul.f32 %v4472_v62, %v1368_v37  ;;  %v4645_v7 = vadd.f32 %v1374_v29, %v1330_v51  ;;  %v1619_v37 = vld [vmem:[#allocation5 + $0x35] ss:$8 sm:$0x3] }
  0xb6   : > { %v1401_v53 = vcombine.high %v1400_v52, %v1400_v52  ;;  %v1408_v28 = vrot.slane %v1400_v52, %v4288_v8  ;;  %v1437_v26 = vcombine.low %v1432_v11, %v1436_v39  ;;  %v1485_v16 = vcombine.low %v1480_v44, %v1484_v27 }
  0xb7   : > { %5561 = vst [vmem:[#allocation12_spill] sm:$0xff] %v4645_v7  ;;  %v1377_v17 = vmul.f32 %v4481_v15, %v1369_v12  ;;  %v4649_v55 = vadd.f32 %v1375_v24, %v1331_v49  ;;  %v4651_v13 = vadd.f32 %v1376_v50, %v1332_v21  ;;  %v1528_v4 = vrot.slane %v1523_v31, %v4284_v5 }
  0xb8   : > { %v1415_v3 = vrot.slane %v1401_v53, %v4288_v8  ;;  %v1416_v10 = vcombine.high %v1408_v28, %v1408_v28  ;;  %v1422_v51 = vmul.f32 %v1408_v28, %v4309_v35  ;;  %v1444_v63 = vrot.slane %v1437_v26, %v4288_v8 }
  0xb9   : > { %5562 = vst [vmem:[#allocation13_spill] sm:$0xff] %v4649_v55  ;;  %5563 = vst [vmem:[#allocation22_spill] sm:$0xff] %v4651_v13  ;;  %v4657_v18 = vadd.f32 %v1377_v17, %v1333_v56  ;;  %v1492_v11 = vrot.slane %v1485_v16, %v4288_v8  ;;  %v1532_v23 = vrot.slane %v1523_v31, %v4286_v6 }
  0xba   : > { %v1576_v49 = vrot.slane %v1571_v46, %v4284_v5  ;;  %v1417_v21 = vcombine.high %v1415_v3, %v1415_v3  ;;  %v1423_v29 = vmul.f32 %v4312_v36, %v1415_v3  ;;  %v1424_v52 = vmul.f32 %v4321_v41, %v1416_v10 }
  0xbb   : > { %5564 = vst [vmem:[#allocation23_spill] sm:$0xff] %v4657_v18  ;;  %v1445_v39 = vcombine.high %v1444_v63, %v1444_v63  ;;  %v1452_v44 = vrot.slane %v1444_v63, %v4288_v8  ;;  %v1493_v35 = vcombine.high %v1492_v11, %v1492_v11  ;;  %v1500_v27 = vrot.slane %v1492_v11, %v4288_v8 }
  0xbc   : > { %v1533_v56 = vcombine.low %v1528_v4, %v1532_v23  ;;  %v1425_v12 = vmul.f32 %v4329_v47, %v1417_v21  ;;  %v1580_v31 = vrot.slane %v1571_v46, %v4286_v6  ;;  %v1624_v50 = vrot.slane %v1619_v37, %v4284_v5  ;;  %v5565_v47 = vld [vmem:[#allocation11_spill] sm:$0xff] }
  0xbd   : > { %v1459_v24 = vrot.slane %v1445_v39, %v4288_v8  ;;  %v1460_v53 = vcombine.high %v1452_v44, %v1452_v44  ;;  %v1466_v36 = vmul.f32 %v4324_v42, %v1452_v44  ;;  %v1507_v41 = vrot.slane %v1493_v35, %v4288_v8 }
  0xbe   : > { %v1508_v28 = vcombine.high %v1500_v27, %v1500_v27  ;;  %v1514_v17 = vmul.f32 %v4346_v59, %v1500_v27  ;;  %v1540_v4 = vrot.slane %v1533_v56, %v4288_v8 }
  0xbf   : > { %v1461_v26 = vcombine.high %v1459_v24, %v1459_v24  ;;  %v1467_v16 = vmul.f32 %v4332_v48, %v1459_v24  ;;  %v1468_v3 = vmul.f32 %v5565_v47, %v1460_v53  ;;  %v1470_v10 = vadd.f32 %v1466_v36, %v1422_v51  ;;  %v1667_v24 = vld [vmem:[#allocation5 + $0x36] ss:$8 sm:$0x3] }
  0xc0   : > { %v1509_v63 = vcombine.high %v1507_v41, %v1507_v41  ;;  %v1515_v46 = vmul.f32 %v4349_v60, %v1507_v41  ;;  %v1516_v42 = vmul.f32 %v4354_v1, %v1508_v28  ;;  %v1541_v21 = vcombine.high %v1540_v4, %v1540_v4  ;;  %v1715_v41 = vld [vmem:[#allocation5 + $0x37] ss:$8 sm:$0x3] }
  0xc1   : > { %v1469_v11 = vmul.f32 %v4340_v54, %v1461_v26  ;;  %v1471_v23 = vadd.f32 %v1467_v16, %v1423_v29  ;;  %v1472_v39 = vadd.f32 %v1468_v3, %v1424_v52  ;;  %v1518_v48 = vadd.f32 %v1514_v17, %v1470_v10 }
  0xc2   : > { %v1517_v44 = vmul.f32 %v4357_v2, %v1509_v63  ;;  %v1548_v59 = vrot.slane %v1540_v4, %v4288_v8  ;;  %v1555_v56 = vrot.slane %v1541_v21, %v4288_v8  ;;  %v1581_v51 = vcombine.low %v1576_v49, %v1580_v31 }
  0xc3   : > { %v1473_v35 = vadd.f32 %v1469_v11, %v1425_v12  ;;  %v1519_v27 = vadd.f32 %v1515_v46, %v1471_v23  ;;  %v1520_v53 = vadd.f32 %v1516_v42, %v1472_v39  ;;  %v1628_v29 = vrot.slane %v1619_v37, %v4286_v6 }
  0xc4   : > { %v1556_v60 = vcombine.high %v1548_v59, %v1548_v59  ;;  %v1562_v54 = vmul.f32 %v4364_v14, %v1548_v59  ;;  %v1557_v36 = vcombine.high %v1555_v56, %v1555_v56  ;;  %v1563_v52 = vmul.f32 %v4371_v19, %v1555_v56 }
  0xc5   : > { %v1521_v1 = vadd.f32 %v1517_v44, %v1473_v35  ;;  %v1588_v2 = vrot.slane %v1581_v51, %v4288_v8  ;;  %v1629_v26 = vcombine.low %v1624_v50, %v1628_v29  ;;  %v1672_v49 = vrot.slane %v1667_v24, %v4284_v5 }
  0xc6   : > { %v1564_v12 = vmul.f32 %v4374_v20, %v1556_v60  ;;  %v1566_v28 = vadd.f32 %v1562_v54, %v1518_v48  ;;  %v1565_v31 = vmul.f32 %v4380_v30, %v1557_v36  ;;  %v1567_v16 = vadd.f32 %v1563_v52, %v1519_v27  ;;  %v1807_v36 = vld [vmem:[#allocation5 + $0x41] ss:$8 sm:$0x3] }
  0xc7   : > { %v1589_v17 = vcombine.high %v1588_v2, %v1588_v2  ;;  %v1596_v14 = vrot.slane %v1588_v2, %v4288_v8  ;;  %v1636_v4 = vrot.slane %v1629_v26, %v4288_v8  ;;  %v1676_v19 = vrot.slane %v1667_v24, %v4286_v6  ;;  %v1763_v24 = vld [vmem:[#allocation5 + $0x40] ss:$8 sm:$0x3] }
  0xc8   : > { %v1568_v37 = vadd.f32 %v1564_v12, %v1520_v53  ;;  %v1720_v47 = vrot.slane %v1715_v41, %v4284_v5  ;;  %v1569_v3 = vadd.f32 %v1565_v31, %v1521_v1  ;;  %v1724_v11 = vrot.slane %v1715_v41, %v4286_v6 }
  0xc9   : > { %v1603_v20 = vrot.slane %v1589_v17, %v4288_v8  ;;  %v1604_v10 = vcombine.high %v1596_v14, %v1596_v14  ;;  %v1610_v50 = vmul.f32 %v4385_v43, %v1596_v14  ;;  %v1637_v63 = vcombine.high %v1636_v4, %v1636_v4 }
  0xca   : > { %v1644_v30 = vrot.slane %v1636_v4, %v4288_v8  ;;  %v1677_v46 = vcombine.low %v1672_v49, %v1676_v19  ;;  %v1725_v51 = vcombine.low %v1720_v47, %v1724_v11  ;;  %v1768_v41 = vrot.slane %v1763_v24, %v4284_v5  ;;  %v1903_v11 = vld [vmem:[#allocation5 + $0x43] ss:$8 sm:$0x3] }
  0xcb   : > { %v1605_v23 = vcombine.high %v1603_v20, %v1603_v20  ;;  %v1611_v42 = vmul.f32 %v4393_v57, %v1603_v20  ;;  %v1612_v21 = vmul.f32 %v4396_v33, %v1604_v10  ;;  %v1614_v39 = vadd.f32 %v1610_v50, %v1566_v28 }
  0xcc   : > { %v1651_v44 = vrot.slane %v1637_v63, %v4288_v8  ;;  %v1652_v48 = vcombine.high %v1644_v30, %v1644_v30  ;;  %v1658_v59 = vmul.f32 %v4406_v0, %v1644_v30  ;;  %v1684_v35 = vrot.slane %v1677_v46, %v4288_v8 }
  0xcd   : > { %v1613_v43 = vmul.f32 %v4411_v9, %v1605_v23  ;;  %v1615_v27 = vadd.f32 %v1611_v42, %v1567_v16  ;;  %v1616_v56 = vadd.f32 %v1612_v21, %v1568_v37  ;;  %v1732_v0 = vrot.slane %v1725_v51, %v4288_v8 }
  0xce   : > { %v1653_v53 = vcombine.high %v1651_v44, %v1651_v44  ;;  %v1659_v60 = vmul.f32 %v4417_v34, %v1651_v44  ;;  %v1660_v57 = vmul.f32 %v4420_v40, %v1652_v48  ;;  %v1662_v33 = vadd.f32 %v1658_v59, %v1614_v39 }
  0xcf   : > { %v1617_v54 = vadd.f32 %v1613_v43, %v1569_v3  ;;  %v1685_v29 = vcombine.high %v1684_v35, %v1684_v35  ;;  %v1692_v1 = vrot.slane %v1684_v35, %v4288_v8  ;;  %v1733_v40 = vcombine.high %v1732_v0, %v1732_v0  ;;  %v1855_v3 = vld [vmem:[#allocation5 + $0x42] ss:$8 sm:$0x3] }
  0xd0   : > { %v1661_v52 = vmul.f32 %v4430_v25, %v1653_v53  ;;  %v1663_v9 = vadd.f32 %v1659_v60, %v1615_v27  ;;  %v1664_v2 = vadd.f32 %v1660_v57, %v1616_v56  ;;  %v1740_v49 = vrot.slane %v1732_v0, %v4288_v8  ;;  %v4744_v60 = vld [vmem:[%s4274_s19] ss:$8 sm:$0x3] }
  0xd1   : > { %v1699_v12 = vrot.slane %v1685_v29, %v4288_v8  ;;  %v1700_v28 = vcombine.high %v1692_v1, %v1692_v1  ;;  %v1706_v34 = vmul.f32 %v5559_v45, %v1692_v1  ;;  %v1772_v31 = vrot.slane %v1763_v24, %v4286_v6 }
  0xd2   : > { %v1665_v26 = vadd.f32 %v1661_v52, %v1617_v54  ;;  %v1812_v16 = vrot.slane %v1807_v36, %v4284_v5  ;;  %v1747_v4 = vrot.slane %v1733_v40, %v4288_v8  ;;  %v1748_v19 = vcombine.high %v1740_v49, %v1740_v49  ;;  %v4752_v52 = vld [vmem:[%s4274_s19 + $0x10] ss:$8 sm:$0x3] }
  0xd3   : > { %v1701_v17 = vcombine.high %v1699_v12, %v1699_v12  ;;  %v1707_v25 = vmul.f32 %v4435_v32, %v1699_v12  ;;  %v1708_v14 = vmul.f32 %v5560_v22, %v1700_v28  ;;  %v1710_v37 = vadd.f32 %v1706_v34, %v1662_v33  ;;  %v4761_v34 = vld [vmem:[%s4274_s19 + $0x1] ss:$8 sm:$0x3] }
  0xd4   : > { %v1754_v47 = vmul.f32 %v4461_v38, %v1740_v49  ;;  %v1773_v45 = vcombine.low %v1768_v41, %v1772_v31  ;;  %v1816_v63 = vrot.slane %v1807_v36, %v4286_v6  ;;  %v1749_v30 = vcombine.high %v1747_v4, %v1747_v4  ;;  %5570 = vst [vmem:[#allocation27_spill] sm:$0xff] %v4761_v34  ;;  %v4766_v31 = vld [vmem:[%s4274_s19 + $0x30] ss:$8 sm:$0x3] }
  0xd5   : > { %v1709_v20 = vmul.f32 %v4445_v58, %v1701_v17  ;;  %v1711_v10 = vadd.f32 %v1707_v25, %v1663_v9  ;;  %v1712_v50 = vadd.f32 %v1708_v14, %v1664_v2  ;;  %v1755_v46 = vmul.f32 %v4469_v61, %v1747_v4  ;;  %v4726_v58 = vld [vmem:[#allocation5 + $0x44] ss:$8 sm:$0x3]  ;;  %v4756_v2 = vld [vmem:[%s4274_s19 + $0x20] ss:$8 sm:$0x3] }
  0xd6   : > { %v1756_v32 = vmul.f32 %v4472_v62, %v1748_v19  ;;  %v4722_v22 = vadd.f32 %v1754_v47, %v1710_v37  ;;  %v1780_v42 = vrot.slane %v1773_v45, %v4288_v8  ;;  %v1817_v38 = vcombine.low %v1812_v16, %v1816_v63  ;;  %5571 = vst [vmem:[#allocation28_spill] sm:$0xff] %v4766_v31  ;;  %v4770_v25 = vld [vmem:[%s4274_s19 + $0x11] ss:$8 sm:$0x3] }
  0xd7   : > { %v1713_v23 = vadd.f32 %v1709_v20, %v1665_v26  ;;  %v1860_v21 = vrot.slane %v1855_v3, %v4284_v5  ;;  %v1757_v39 = vmul.f32 %v4481_v15, %v1749_v30  ;;  %v4729_v44 = vadd.f32 %v1755_v46, %v1711_v10  ;;  %5572 = vst [vmem:[#allocation29_spill] sm:$0xff] %v4770_v25  ;;  %v4775_v4 = vld [vmem:[%s4274_s19 + $0x21] ss:$8 sm:$0x3] }
  0xd8   : > { %5566 = vst [vmem:[#allocation11_spill] sm:$0xff] %v4722_v22  ;;  %v4731_v48 = vadd.f32 %v1756_v32, %v1712_v50  ;;  %v1864_v61 = vrot.slane %v1855_v3, %v4286_v6  ;;  %v1781_v62 = vcombine.high %v1780_v42, %v1780_v42  ;;  %v1788_v59 = vrot.slane %v1780_v42, %v4288_v8  ;;  %v4780_v20 = vld [vmem:[%s4274_s19 + $0x31] ss:$8 sm:$0x3] }
  0xd9   : > { %5567 = vst [vmem:[#allocation24_spill] sm:$0xff] %v4729_v44  ;;  %v1824_v35 = vrot.slane %v1817_v38, %v4288_v8  ;;  %v1908_v43 = vrot.slane %v1903_v11, %v4284_v5  ;;  %v4737_v27 = vadd.f32 %v1757_v39, %v1713_v23  ;;  %v1912_v15 = vrot.slane %v1903_v11, %v4286_v6  ;;  %v4784_v63 = vld [vmem:[%s4274_s19 + $0x2] ss:$8 sm:$0x3] }
  0xda   : > { %5568 = vst [vmem:[#allocation25_spill] sm:$0xff] %v4731_v48  ;;  %v1865_v56 = vcombine.low %v1860_v21, %v1864_v61  ;;  %v1956_v51 = vrot.slane %v4726_v58, %v4284_v5  ;;  %v1795_v24 = vrot.slane %v1781_v62, %v4288_v8  ;;  %v1796_v53 = vcombine.high %v1788_v59, %v1788_v59  ;;  %v4788_v23 = vld [vmem:[%s4274_s19 + $0x12] ss:$8 sm:$0x3] }
  0xdb   : > { %5569 = vst [vmem:[#allocation26_spill] sm:$0xff] %v4737_v27  ;;  %v1802_v57 = vmul.f32 %v4744_v60, %v1788_v59  ;;  %v1825_v33 = vcombine.high %v1824_v35, %v1824_v35  ;;  %v1832_v54 = vrot.slane %v1824_v35, %v4288_v8  ;;  %v1913_v1 = vcombine.low %v1908_v43, %v1912_v15  ;;  %v4792_v38 = vld [vmem:[%s4274_s19 + $0x22] ss:$8 sm:$0x3] }
  0xdc   : > { %v1872_v29 = vrot.slane %v1865_v56, %v4288_v8  ;;  %v1960_v0 = vrot.slane %v4726_v58, %v4286_v6  ;;  %v1797_v36 = vcombine.high %v1795_v24, %v1795_v24  ;;  %v1803_v9 = vmul.f32 %v4752_v52, %v1795_v24  ;;  %5573 = vst [vmem:[#allocation30_spill] sm:$0xff] %v4784_v63  ;;  %v1999_v59 = vld [vmem:[#allocation5 + $0x45] ss:$8 sm:$0x3] }
  0xdd   : > { %v1804_v41 = vmul.f32 %v4756_v2, %v1796_v53  ;;  %v1839_v12 = vrot.slane %v1825_v33, %v4288_v8  ;;  %v1840_v28 = vcombine.high %v1832_v54, %v1832_v54  ;;  %v1846_v40 = vmul.f32 %v4761_v34, %v1832_v54  ;;  %v4798_v35 = vld [vmem:[%s4274_s19 + $0x32] ss:$8 sm:$0x3]  ;;  %v4802_v33 = vld [vmem:[%s4274_s19 + $0x3] ss:$8 sm:$0x3] }
  0xde   : > { %v1873_v26 = vcombine.high %v1872_v29, %v1872_v29  ;;  %v1880_v49 = vrot.slane %v1872_v29, %v4288_v8  ;;  %v1805_v16 = vmul.f32 %v4766_v31, %v1797_v36  ;;  %v1920_v37 = vrot.slane %v1913_v1, %v4288_v8  ;;  %v4806_v29 = vld [vmem:[%s4274_s19 + $0x13] ss:$8 sm:$0x3]  ;;  %v2047_v36 = vld [vmem:[#allocation5 + $0x46] ss:$8 sm:$0x3] }
  0xdf   : > { %v1841_v17 = vcombine.high %v1839_v12, %v1839_v12  ;;  %v1847_v14 = vmul.f32 %v4770_v25, %v1839_v12  ;;  %v1848_v19 = vmul.f32 %v4775_v4, %v1840_v28  ;;  %v1850_v47 = vadd.f32 %v1846_v40, %v1802_v57  ;;  %v2095_v40 = vld [vmem:[#allocation5 + $0x47] ss:$8 sm:$0x3] }
  0xe0   : > { %v1887_v45 = vrot.slane %v1873_v26, %v4288_v8  ;;  %v1888_v3 = vcombine.high %v1880_v49, %v1880_v49  ;;  %v1894_v30 = vmul.f32 %v4784_v63, %v1880_v49  ;;  %v1921_v46 = vcombine.high %v1920_v37, %v1920_v37  ;;  %v4817_v26 = vld [vmem:[%s4274_s19 + $0x33] ss:$8 sm:$0x3] }
  0xe1   : > { %v1849_v10 = vmul.f32 %v4780_v20, %v1841_v17  ;;  %v1851_v50 = vadd.f32 %v1847_v14, %v1803_v9  ;;  %v1852_v32 = vadd.f32 %v1848_v19, %v1804_v41  ;;  %v1928_v61 = vrot.slane %v1920_v37, %v4288_v8 }
  0xe2   : > { %v1889_v11 = vcombine.high %v1887_v45, %v1887_v45  ;;  %v1895_v42 = vmul.f32 %v4788_v23, %v1887_v45  ;;  %v1896_v21 = vmul.f32 %v4792_v38, %v1888_v3  ;;  %v1898_v39 = vadd.f32 %v1894_v30, %v1850_v47  ;;  %v2143_v45 = vld [vmem:[#allocation5 + $0x50] ss:$8 sm:$0x3] }
  0xe3   : > { %v1853_v58 = vadd.f32 %v1849_v10, %v1805_v16  ;;  %v1935_v62 = vrot.slane %v1921_v46, %v4288_v8  ;;  %v1961_v24 = vcombine.low %v1956_v51, %v1960_v0  ;;  %v1936_v53 = vcombine.high %v1928_v61, %v1928_v61  ;;  %v4813_v51 = vld [vmem:[%s4274_s19 + $0x23] ss:$8 sm:$0x3] }
  0xe4   : > { %v1897_v43 = vmul.f32 %v4798_v35, %v1889_v11  ;;  %v1899_v56 = vadd.f32 %v1895_v42, %v1851_v50  ;;  %v1900_v15 = vadd.f32 %v1896_v21, %v1852_v32  ;;  %v1942_v54 = vmul.f32 %v4802_v33, %v1928_v61  ;;  %v4826_v11 = vld [vmem:[%s4274_s19 + $0x4] ss:$8 sm:$0x3] }
  0xe5   : > { %v1937_v57 = vcombine.high %v1935_v62, %v1935_v62  ;;  %v1943_v1 = vmul.f32 %v4806_v29, %v1935_v62  ;;  %v1968_v41 = vrot.slane %v1961_v24, %v4288_v8  ;;  %v2004_v12 = vrot.slane %v1999_v59, %v4284_v5 }
  0xe6   : > { %v1901_v9 = vadd.f32 %v1897_v43, %v1853_v58  ;;  %v2008_v28 = vrot.slane %v1999_v59, %v4286_v6  ;;  %v1944_v0 = vmul.f32 %v4813_v51, %v1936_v53  ;;  %v1946_v16 = vadd.f32 %v1942_v54, %v1898_v39  ;;  %v4834_v43 = vld [vmem:[%s4274_s19 + $0x14] ss:$8 sm:$0x3] }
  0xe7   : > { %v1945_v49 = vmul.f32 %v4817_v26, %v1937_v57  ;;  %v1947_v17 = vadd.f32 %v1943_v1, %v1899_v56  ;;  %v1969_v14 = vcombine.high %v1968_v41, %v1968_v41  ;;  %v1976_v37 = vrot.slane %v1968_v41, %v4288_v8 }
  0xe8   : > { %v2009_v19 = vcombine.low %v2004_v12, %v2008_v28  ;;  %v2052_v47 = vrot.slane %v2047_v36, %v4284_v5  ;;  %v1948_v3 = vadd.f32 %v1944_v0, %v1900_v15  ;;  %v2056_v50 = vrot.slane %v2047_v36, %v4286_v6  ;;  %v4838_v15 = vld [vmem:[%s4274_s19 + $0x24] ss:$8 sm:$0x3] }
  0xe9   : > { %v1949_v10 = vadd.f32 %v1945_v49, %v1901_v9  ;;  %v2100_v30 = vrot.slane %v2095_v40, %v4284_v5  ;;  %v1983_v46 = vrot.slane %v1969_v14, %v4288_v8  ;;  %v1984_v32 = vcombine.high %v1976_v37, %v1976_v37  ;;  %v4844_v9 = vld [vmem:[%s4274_s19 + $0x34] ss:$8 sm:$0x3] }
  0xea   : > { %v1990_v42 = vmul.f32 %v4826_v11, %v1976_v37  ;;  %v2016_v21 = vrot.slane %v2009_v19, %v4288_v8  ;;  %v2057_v58 = vcombine.low %v2052_v47, %v2056_v50  ;;  %v2104_v39 = vrot.slane %v2095_v40, %v4286_v6 }
  0xeb   : > { %v2148_v61 = vrot.slane %v2143_v45, %v4284_v5  ;;  %v2152_v62 = vrot.slane %v2143_v45, %v4286_v6  ;;  %v1985_v59 = vcombine.high %v1983_v46, %v1983_v46  ;;  %v1991_v56 = vmul.f32 %v4834_v43, %v1983_v46  ;;  %v4860_v46 = vld [vmem:[%s4274_s19 + $0x25] ss:$8 sm:$0x3] }
  0xec   : > { %v1992_v24 = vmul.f32 %v4838_v15, %v1984_v32  ;;  %v1994_v53 = vadd.f32 %v1990_v42, %v1946_v16  ;;  %v2017_v57 = vcombine.high %v2016_v21, %v2016_v21  ;;  %v2024_v54 = vrot.slane %v2016_v21, %v4288_v8  ;;  %v4849_v16 = vld [vmem:[%s4274_s19 + $0x5] ss:$8 sm:$0x3] }
  0xed   : > { %v2064_v1 = vrot.slane %v2057_v58, %v4288_v8  ;;  %v2105_v36 = vcombine.low %v2100_v30, %v2104_v39  ;;  %v1993_v41 = vmul.f32 %v4844_v9, %v1985_v59  ;;  %v1995_v12 = vadd.f32 %v1991_v56, %v1947_v17  ;;  %v4865_v58 = vld [vmem:[%s4274_s19 + $0x6] ss:$8 sm:$0x3] }
  0xee   : > { %v1996_v28 = vadd.f32 %v1992_v24, %v1948_v3  ;;  %v2153_v40 = vcombine.low %v2148_v61, %v2152_v62  ;;  %v2031_v0 = vrot.slane %v2017_v57, %v4288_v8  ;;  %v2032_v49 = vcombine.high %v2024_v54, %v2024_v54  ;;  %v4856_v3 = vld [vmem:[%s4274_s19 + $0x15] ss:$8 sm:$0x3] }
  0xef   : > { %v2038_v14 = vmul.f32 %v4849_v16, %v2024_v54  ;;  %v2065_v37 = vcombine.high %v2064_v1, %v2064_v1  ;;  %v1997_v19 = vadd.f32 %v1993_v41, %v1949_v10  ;;  %v2072_v47 = vrot.slane %v2064_v1, %v4288_v8  ;;  %v4869_v62 = vld [vmem:[%s4274_s19 + $0x35] ss:$8 sm:$0x3] }
  0xf0   : > { %v2112_v45 = vrot.slane %v2105_v36, %v4288_v8  ;;  %v2160_v50 = vrot.slane %v2153_v40, %v4288_v8  ;;  %v2033_v17 = vcombine.high %v2031_v0, %v2031_v0  ;;  %v2039_v30 = vmul.f32 %v4856_v3, %v2031_v0  ;;  %v4878_v36 = vld [vmem:[%s4274_s19 + $0x26] ss:$8 sm:$0x3] }
  0xf1   : > { %v2040_v32 = vmul.f32 %v4860_v46, %v2032_v49  ;;  %v2042_v42 = vadd.f32 %v2038_v14, %v1994_v53  ;;  %v2079_v10 = vrot.slane %v2065_v37, %v4288_v8  ;;  %v2080_v21 = vcombine.high %v2072_v47, %v2072_v47  ;;  %v4874_v53 = vld [vmem:[%s4274_s19 + $0x16] ss:$8 sm:$0x3]  ;;  %v2187_v37 = vld [vmem:[#allocation5 + $0x51] ss:$8 sm:$0x3] }
  0xf2   : > { %v2086_v39 = vmul.f32 %v4865_v58, %v2072_v47  ;;  %v2113_v61 = vcombine.high %v2112_v45, %v2112_v45  ;;  %v2041_v59 = vmul.f32 %v4869_v62, %v2033_v17  ;;  %v2043_v56 = vadd.f32 %v2039_v30, %v1995_v12  ;;  %v4883_v12 = vld [vmem:[%s4274_s19 + $0x7] ss:$8 sm:$0x3]  ;;  %v4887_v47 = vld [vmem:[%s4274_s19 + $0x36] ss:$8 sm:$0x3] }
  0xf3   : > { %v2044_v24 = vadd.f32 %v2040_v32, %v1996_v28  ;;  %v2120_v57 = vrot.slane %v2112_v45, %v4288_v8  ;;  %v2081_v54 = vcombine.high %v2079_v10, %v2079_v10  ;;  %v2087_v1 = vmul.f32 %v4874_v53, %v2079_v10 }
  0xf4   : > { %v2088_v41 = vmul.f32 %v4878_v36, %v2080_v21  ;;  %v2090_v40 = vadd.f32 %v2086_v39, %v2042_v42  ;;  %v2045_v0 = vadd.f32 %v2041_v59, %v1997_v19  ;;  %v2127_v49 = vrot.slane %v2113_v61, %v4288_v8  ;;  %v4891_v21 = vld [vmem:[%s4274_s19 + $0x17] ss:$8 sm:$0x3]  ;;  %v4895_v42 = vld [vmem:[%s4274_s19 + $0x27] ss:$8 sm:$0x3] }
  0xf5   : > { %v2128_v14 = vcombine.high %v2120_v57, %v2120_v57  ;;  %v2134_v28 = vmul.f32 %v4883_v12, %v2120_v57  ;;  %v2089_v45 = vmul.f32 %v4887_v47, %v2081_v54  ;;  %v2091_v17 = vadd.f32 %v2087_v1, %v2043_v56  ;;  %v4904_v54 = vld [vmem:[%s4274_s19 + $0x37] ss:$8 sm:$0x3] }
  0xf6   : > { %v2092_v30 = vadd.f32 %v2088_v41, %v2044_v24  ;;  %v2161_v32 = vcombine.high %v2160_v50, %v2160_v50  ;;  %v2129_v10 = vcombine.high %v2127_v49, %v2127_v49  ;;  %v2135_v19 = vmul.f32 %v4891_v21, %v2127_v49  ;;  %v2235_v24 = vld [vmem:[#allocation5 + $0x52] ss:$8 sm:$0x3] }
  0xf7   : > { %v2136_v39 = vmul.f32 %v4895_v42, %v2128_v14  ;;  %v4898_v61 = vadd.f32 %v2134_v28, %v2090_v40  ;;  %v2093_v59 = vadd.f32 %v2089_v45, %v2045_v0  ;;  %v2168_v57 = vrot.slane %v2160_v50, %v4288_v8  ;;  %v2283_v40 = vld [vmem:[#allocation5 + $0x53] ss:$8 sm:$0x3] }
  0xf8   : > { %v2175_v27 = vrot.slane %v2161_v32, %v4288_v8  ;;  %v2192_v56 = vrot.slane %v2187_v37, %v4284_v5  ;;  %v2137_v1 = vmul.f32 %v4904_v54, %v2129_v10  ;;  %v4907_v41 = vadd.f32 %v2135_v19, %v2091_v17  ;;  %v2331_v32 = vld [vmem:[#allocation5 + $0x54] ss:$8 sm:$0x3]  ;;  %v2379_v10 = vld [vmem:[#allocation5 + $0x55] ss:$8 sm:$0x3] }
  0xf9   : > { %5574 = vst [vmem:[#allocation31_spill] sm:$0xff] %v4898_v61  ;;  %v4909_v49 = vadd.f32 %v2136_v39, %v2092_v30  ;;  %v2196_v14 = vrot.slane %v2187_v37, %v4286_v6  ;;  %v2176_v28 = vcombine.high %v2168_v57, %v2168_v57  ;;  %v2182_v50 = vmul.f32 %v4744_v60, %v2168_v57  ;;  %v4918_v30 = vld [vmem:[#allocation5 + $0x56] ss:$8 sm:$0x3] }
  0xfa   : > { %5575 = vst [vmem:[#allocation32_spill] sm:$0xff] %v4907_v41  ;;  %v2177_v0 = vcombine.high %v2175_v27, %v2175_v27  ;;  %v2183_v45 = vmul.f32 %v4752_v52, %v2175_v27  ;;  %v4914_v61 = vadd.f32 %v2137_v1, %v2093_v59  ;;  %v2240_v44 = vrot.slane %v2235_v24, %v4284_v5 }
  0xfb   : > { %5576 = vst [vmem:[#allocation33_spill] sm:$0xff] %v4909_v49  ;;  %v2197_v48 = vcombine.low %v2192_v56, %v2196_v14  ;;  %v2244_v17 = vrot.slane %v2235_v24, %v4286_v6  ;;  %v2184_v37 = vmul.f32 %v4756_v2, %v2176_v28  ;;  %v2288_v39 = vrot.slane %v2283_v40, %v4284_v5  ;;  %v4927_v14 = vld [vmem:[#allocation5 + $0x57] ss:$8 sm:$0x3] }
  0xfc   : > { %5577 = vst [vmem:[#allocation34_spill] sm:$0xff] %v4914_v61  ;;  %v2185_v19 = vmul.f32 %v4766_v31, %v2177_v0  ;;  %v2292_v57 = vrot.slane %v2283_v40, %v4286_v6  ;;  %v2336_v56 = vrot.slane %v2331_v32, %v4284_v5  ;;  %v2340_v1 = vrot.slane %v2331_v32, %v4286_v6 }
  0xfd   : > { %v2204_v27 = vrot.slane %v2197_v48, %v4288_v8  ;;  %v2245_v59 = vcombine.low %v2240_v44, %v2244_v17  ;;  %v2384_v61 = vrot.slane %v2379_v10, %v4284_v5  ;;  %v2388_v28 = vrot.slane %v2379_v10, %v4286_v6 }
  0xfe   : > { %v2293_v24 = vcombine.low %v2288_v39, %v2292_v57  ;;  %v2432_v0 = vrot.slane %v4918_v30, %v4284_v5  ;;  %v2341_v44 = vcombine.low %v2336_v56, %v2340_v1  ;;  %v2436_v32 = vrot.slane %v4918_v30, %v4286_v6 }
  0xff   : > { %v2205_v49 = vcombine.high %v2204_v27, %v2204_v27  ;;  %v2212_v40 = vrot.slane %v2204_v27, %v4288_v8  ;;  %v2252_v48 = vrot.slane %v2245_v59, %v4288_v8  ;;  %v2389_v41 = vcombine.low %v2384_v61, %v2388_v28 }
 0x100   : > { %v2300_v17 = vrot.slane %v2293_v24, %v4288_v8  ;;  %v2480_v39 = vrot.slane %v4927_v14, %v4284_v5  ;;  %v2348_v56 = vrot.slane %v2341_v44, %v4288_v8 }
 0x101   : > { %v2219_v10 = vrot.slane %v2205_v49, %v4288_v8  ;;  %v2220_v57 = vcombine.high %v2212_v40, %v2212_v40  ;;  %v2226_v22 = vmul.f32 %v4761_v34, %v2212_v40  ;;  %v2253_v18 = vcombine.high %v2252_v48, %v2252_v48 }
 0x102   : > { %v2260_v27 = vrot.slane %v2252_v48, %v4288_v8  ;;  %v2301_v13 = vcombine.high %v2300_v17, %v2300_v17  ;;  %v2308_v59 = vrot.slane %v2300_v17, %v4288_v8 }
 0x103   : > { %v2221_v61 = vcombine.high %v2219_v10, %v2219_v10  ;;  %v2227_v1 = vmul.f32 %v4770_v25, %v2219_v10  ;;  %v2228_v30 = vmul.f32 %v4775_v4, %v2220_v57  ;;  %v2230_v24 = vadd.f32 %v2226_v22, %v2182_v50 }
 0x104   : > { %v2267_v28 = vrot.slane %v2253_v18, %v4288_v8  ;;  %v2268_v49 = vcombine.high %v2260_v27, %v2260_v27  ;;  %v2274_v55 = vmul.f32 %v4784_v63, %v2260_v27  ;;  %v2315_v40 = vrot.slane %v2301_v13, %v4288_v8 }
 0x105   : > { %v2229_v48 = vmul.f32 %v4780_v20, %v2221_v61  ;;  %v2231_v7 = vadd.f32 %v2227_v1, %v2183_v45  ;;  %v2232_v31 = vadd.f32 %v2228_v30, %v2184_v37  ;;  %v2316_v17 = vcombine.high %v2308_v59, %v2308_v59 }
 0x106   : > { %v2269_v34 = vcombine.high %v2267_v28, %v2267_v28  ;;  %v2275_v44 = vmul.f32 %v4788_v23, %v2267_v28  ;;  %v2276_v10 = vmul.f32 %v4792_v38, %v2268_v49  ;;  %v2278_v25 = vadd.f32 %v2274_v55, %v2230_v24 }
 0x107   : > { %v2233_v57 = vadd.f32 %v2229_v48, %v2185_v19  ;;  %v2317_v22 = vcombine.high %v2315_v40, %v2315_v40  ;;  %v2322_v18 = vmul.f32 %v4802_v33, %v2308_v59  ;;  %v2323_v50 = vmul.f32 %v4806_v29, %v2315_v40 }
 0x108   : > { %v2277_v27 = vmul.f32 %v4798_v35, %v2269_v34  ;;  %v2279_v13 = vadd.f32 %v2275_v44, %v2231_v7  ;;  %v2280_v63 = vadd.f32 %v2276_v10, %v2232_v31  ;;  %v2324_v45 = vmul.f32 %v4813_v51, %v2316_v17 }
 0x109   : > { %v2325_v37 = vmul.f32 %v4817_v26, %v2317_v22  ;;  %v2326_v61 = vadd.f32 %v2322_v18, %v2278_v25  ;;  %v2349_v1 = vcombine.high %v2348_v56, %v2348_v56  ;;  %v2356_v30 = vrot.slane %v2348_v56, %v4288_v8 }
 0x10a   : > { %v2281_v28 = vadd.f32 %v2277_v27, %v2233_v57  ;;  %v2327_v55 = vadd.f32 %v2323_v50, %v2279_v13  ;;  %v2328_v19 = vadd.f32 %v2324_v45, %v2280_v63  ;;  %v2396_v24 = vrot.slane %v2389_v41, %v4288_v8  ;;  %v2523_v27 = vld [vmem:[#allocation5 + $0x60] ss:$8 sm:$0x3] }
 0x10b   : > { %v2363_v59 = vrot.slane %v2349_v1, %v4288_v8  ;;  %v2364_v49 = vcombine.high %v2356_v30, %v2356_v30  ;;  %v2370_v34 = vmul.f32 %v4826_v11, %v2356_v30  ;;  %v2437_v7 = vcombine.low %v2432_v0, %v2436_v32 }
 0x10c   : > { %v2329_v31 = vadd.f32 %v2325_v37, %v2281_v28  ;;  %v2397_v40 = vcombine.high %v2396_v24, %v2396_v24  ;;  %v2404_v48 = vrot.slane %v2396_v24, %v4288_v8  ;;  %v2484_v25 = vrot.slane %v4927_v14, %v4286_v6  ;;  %v2567_v24 = vld [vmem:[#allocation5 + $0x61] ss:$8 sm:$0x3] }
 0x10d   : > { %v2365_v17 = vcombine.high %v2363_v59, %v2363_v59  ;;  %v2371_v56 = vmul.f32 %v4834_v43, %v2363_v59  ;;  %v2372_v63 = vmul.f32 %v4838_v15, %v2364_v49  ;;  %v2374_v44 = vadd.f32 %v2370_v34, %v2326_v61 }
 0x10e   : > { %v2411_v41 = vrot.slane %v2397_v40, %v4288_v8  ;;  %v2412_v10 = vcombine.high %v2404_v48, %v2404_v48  ;;  %v2418_v57 = vmul.f32 %v4849_v16, %v2404_v48  ;;  %v2444_v0 = vrot.slane %v2437_v7, %v4288_v8 }
 0x10f   : > { %v2373_v32 = vmul.f32 %v4844_v9, %v2365_v17  ;;  %v2375_v22 = vadd.f32 %v2371_v56, %v2327_v55  ;;  %v2376_v18 = vadd.f32 %v2372_v63, %v2328_v19  ;;  %v2485_v50 = vcombine.low %v2480_v39, %v2484_v25 }
 0x110   : > { %v2413_v14 = vcombine.high %v2411_v41, %v2411_v41  ;;  %v2419_v13 = vmul.f32 %v4856_v3, %v2411_v41  ;;  %v2420_v45 = vmul.f32 %v4860_v46, %v2412_v10  ;;  %v2422_v37 = vadd.f32 %v2418_v57, %v2374_v44 }
 0x111   : > { %v2377_v61 = vadd.f32 %v2373_v32, %v2329_v31  ;;  %v2445_v1 = vcombine.high %v2444_v0, %v2444_v0  ;;  %v2452_v30 = vrot.slane %v2444_v0, %v4288_v8  ;;  %v2492_v28 = vrot.slane %v2485_v50, %v4288_v8 }
 0x112   : > { %v2421_v59 = vmul.f32 %v4869_v62, %v2413_v14  ;;  %v2423_v49 = vadd.f32 %v2419_v13, %v2375_v22  ;;  %v2424_v55 = vadd.f32 %v2420_v45, %v2376_v18  ;;  %v2528_v39 = vrot.slane %v2523_v27, %v4284_v5  ;;  %v2615_v22 = vld [vmem:[#allocation5 + $0x62] ss:$8 sm:$0x3] }
 0x113   : > { %v2459_v19 = vrot.slane %v2445_v1, %v4288_v8  ;;  %v2460_v34 = vcombine.high %v2452_v30, %v2452_v30  ;;  %v2466_v7 = vmul.f32 %v4865_v58, %v2452_v30  ;;  %v2493_v40 = vcombine.high %v2492_v28, %v2492_v28 }
 0x114   : > { %v2425_v48 = vadd.f32 %v2421_v59, %v2377_v61  ;;  %v2500_v31 = vrot.slane %v2492_v28, %v4288_v8  ;;  %v2532_v25 = vrot.slane %v2523_v27, %v4286_v6  ;;  %v2572_v17 = vrot.slane %v2567_v24, %v4284_v5 }
 0x115   : > { %v2461_v56 = vcombine.high %v2459_v19, %v2459_v19  ;;  %v2467_v63 = vmul.f32 %v4874_v53, %v2459_v19  ;;  %v2468_v44 = vmul.f32 %v4878_v36, %v2460_v34  ;;  %v2470_v41 = vadd.f32 %v2466_v7, %v2422_v37  ;;  %v2663_v37 = vld [vmem:[#allocation5 + $0x63] ss:$8 sm:$0x3]  ;;  %v2711_v19 = vld [vmem:[#allocation5 + $0x64] ss:$8 sm:$0x3] }
 0x116   : > { %v2507_v10 = vrot.slane %v2493_v40, %v4288_v8  ;;  %v2508_v57 = vcombine.high %v2500_v31, %v2500_v31  ;;  %v2514_v0 = vmul.f32 %v4883_v12, %v2500_v31  ;;  %v2533_v32 = vcombine.low %v2528_v39, %v2532_v25 }
 0x117   : > { %v2469_v18 = vmul.f32 %v4887_v47, %v2461_v56  ;;  %v2471_v50 = vadd.f32 %v2467_v63, %v2423_v49  ;;  %v2472_v14 = vadd.f32 %v2468_v44, %v2424_v55  ;;  %v2576_v27 = vrot.slane %v2567_v24, %v4286_v6 }
 0x118   : > { %v2509_v13 = vcombine.high %v2507_v10, %v2507_v10  ;;  %v2515_v45 = vmul.f32 %v4891_v21, %v2507_v10  ;;  %v2516_v61 = vmul.f32 %v4895_v42, %v2508_v57  ;;  %v4990_v1 = vadd.f32 %v2514_v0, %v2470_v41 }
 0x119   : > { %v2473_v30 = vadd.f32 %v2469_v18, %v2425_v48  ;;  %v2540_v28 = vrot.slane %v2533_v32, %v4288_v8  ;;  %v2577_v59 = vcombine.low %v2572_v17, %v2576_v27  ;;  %v2620_v39 = vrot.slane %v2615_v22, %v4284_v5 }
 0x11a   : > { %5578 = vst [vmem:[#allocation35_spill] sm:$0xff] %v4990_v1  ;;  %v2517_v49 = vmul.f32 %v4904_v54, %v2509_v13  ;;  %v4995_v55 = vadd.f32 %v2515_v45, %v2471_v50  ;;  %v4997_v24 = vadd.f32 %v2516_v61, %v2472_v14  ;;  %v2624_v34 = vrot.slane %v2615_v22, %v4286_v6  ;;  %v5582_v61 = vld [vmem:[#allocation27_spill] sm:$0xff] }
 0x11b   : > { %v2541_v7 = vcombine.high %v2540_v28, %v2540_v28  ;;  %v2548_v40 = vrot.slane %v2540_v28, %v4288_v8  ;;  %v2584_v31 = vrot.slane %v2577_v59, %v4288_v8  ;;  %v2668_v48 = vrot.slane %v2663_v37, %v4284_v5  ;;  %v5583_v59 = vld [vmem:[#allocation28_spill] sm:$0xff] }
 0x11c   : > { %5579 = vst [vmem:[#allocation36_spill] sm:$0xff] %v4995_v55  ;;  %5580 = vst [vmem:[#allocation37_spill] sm:$0xff] %v4997_v24  ;;  %v5003_v25 = vadd.f32 %v2517_v49, %v2473_v30  ;;  %v2625_v17 = vcombine.low %v2620_v39, %v2624_v34  ;;  %v2672_v56 = vrot.slane %v2663_v37, %v4286_v6  ;;  %v5584_v34 = vld [vmem:[#allocation29_spill] sm:$0xff] }
 0x11d   : > { %v2716_v63 = vrot.slane %v2711_v19, %v4284_v5  ;;  %v2555_v44 = vrot.slane %v2541_v7, %v4288_v8  ;;  %v2556_v41 = vcombine.high %v2548_v40, %v2548_v40  ;;  %v2562_v10 = vmul.f32 %v4744_v60, %v2548_v40 }
 0x11e   : > { %5581 = vst [vmem:[#allocation38_spill] sm:$0xff] %v5003_v25  ;;  %v2585_v57 = vcombine.high %v2584_v31, %v2584_v31  ;;  %v2592_v0 = vrot.slane %v2584_v31, %v4288_v8  ;;  %v2632_v32 = vrot.slane %v2625_v17, %v4288_v8  ;;  %v2673_v22 = vcombine.low %v2668_v48, %v2672_v56 }
 0x11f   : > { %v2720_v18 = vrot.slane %v2711_v19, %v4286_v6  ;;  %v2557_v50 = vcombine.high %v2555_v44, %v2555_v44  ;;  %v2563_v14 = vmul.f32 %v4752_v52, %v2555_v44  ;;  %v2564_v27 = vmul.f32 %v4756_v2, %v2556_v41  ;;  %v5585_v41 = vld [vmem:[#allocation30_spill] sm:$0xff] }
 0x120   : > { %v2599_v13 = vrot.slane %v2585_v57, %v4288_v8  ;;  %v2600_v45 = vcombine.high %v2592_v0, %v2592_v0  ;;  %v2606_v37 = vmul.f32 %v5582_v61, %v2592_v0  ;;  %v2633_v30 = vcombine.high %v2632_v32, %v2632_v32 }
 0x121   : > { %v2640_v28 = vrot.slane %v2632_v32, %v4288_v8  ;;  %v2565_v39 = vmul.f32 %v5583_v59, %v2557_v50  ;;  %v2680_v19 = vrot.slane %v2673_v22, %v4288_v8 }
 0x122   : > { %v2601_v49 = vcombine.high %v2599_v13, %v2599_v13  ;;  %v2607_v7 = vmul.f32 %v5584_v34, %v2599_v13  ;;  %v2608_v40 = vmul.f32 %v4775_v4, %v2600_v45  ;;  %v2610_v31 = vadd.f32 %v2606_v37, %v2562_v10  ;;  %v2759_v37 = vld [vmem:[#allocation5 + $0x65] ss:$8 sm:$0x3] }
 0x123   : > { %v2647_v48 = vrot.slane %v2633_v30, %v4288_v8  ;;  %v2648_v17 = vcombine.high %v2640_v28, %v2640_v28  ;;  %v2654_v57 = vmul.f32 %v5585_v41, %v2640_v28  ;;  %v2681_v0 = vcombine.high %v2680_v19, %v2680_v19 }
 0x124   : > { %v2609_v56 = vmul.f32 %v4780_v20, %v2601_v49  ;;  %v2611_v44 = vadd.f32 %v2607_v7, %v2563_v14  ;;  %v2612_v32 = vadd.f32 %v2608_v40, %v2564_v27  ;;  %v2688_v45 = vrot.slane %v2680_v19, %v4288_v8 }
 0x125   : > { %v2649_v25 = vcombine.high %v2647_v48, %v2647_v48  ;;  %v2655_v50 = vmul.f32 %v4788_v23, %v2647_v48  ;;  %v2656_v13 = vmul.f32 %v4792_v38, %v2648_v17  ;;  %v2658_v22 = vadd.f32 %v2654_v57, %v2610_v31  ;;  %v2807_v48 = vld [vmem:[#allocation5 + $0x66] ss:$8 sm:$0x3] }
 0x126   : > { %v2613_v24 = vadd.f32 %v2609_v56, %v2565_v39  ;;  %v2695_v10 = vrot.slane %v2681_v0, %v4288_v8  ;;  %v2721_v7 = vcombine.low %v2716_v63, %v2720_v18  ;;  %v2696_v28 = vcombine.high %v2688_v45, %v2688_v45  ;;  %v2855_v56 = vld [vmem:[#allocation5 + $0x67] ss:$8 sm:$0x3] }
 0x127   : > { %v2657_v30 = vmul.f32 %v4798_v35, %v2649_v25  ;;  %v2659_v49 = vadd.f32 %v2655_v50, %v2611_v44  ;;  %v2660_v14 = vadd.f32 %v2656_v13, %v2612_v32  ;;  %v2702_v27 = vmul.f32 %v4802_v33, %v2688_v45 }
 0x128   : > { %v2697_v55 = vcombine.high %v2695_v10, %v2695_v10  ;;  %v2703_v40 = vmul.f32 %v4806_v29, %v2695_v10  ;;  %v2728_v39 = vrot.slane %v2721_v7, %v4288_v8  ;;  %v2764_v19 = vrot.slane %v2759_v37, %v4284_v5 }
 0x129   : > { %v2661_v17 = vadd.f32 %v2657_v30, %v2613_v24  ;;  %v2768_v31 = vrot.slane %v2759_v37, %v4286_v6  ;;  %v2704_v25 = vmul.f32 %v4813_v51, %v2696_v28  ;;  %v2706_v63 = vadd.f32 %v2702_v27, %v2658_v22  ;;  %v2903_v24 = vld [vmem:[#allocation5 + $0x70] ss:$8 sm:$0x3] }
 0x12a   : > { %v2705_v44 = vmul.f32 %v4817_v26, %v2697_v55  ;;  %v2707_v18 = vadd.f32 %v2703_v40, %v2659_v49  ;;  %v2729_v57 = vcombine.high %v2728_v39, %v2728_v39  ;;  %v2736_v0 = vrot.slane %v2728_v39, %v4288_v8 }
 0x12b   : > { %v2769_v32 = vcombine.low %v2764_v19, %v2768_v31  ;;  %v2812_v50 = vrot.slane %v2807_v48, %v4284_v5  ;;  %v2708_v13 = vadd.f32 %v2704_v25, %v2660_v14  ;;  %v2816_v10 = vrot.slane %v2807_v48, %v4286_v6 }
 0x12c   : > { %v2709_v45 = vadd.f32 %v2705_v44, %v2661_v17  ;;  %v2860_v37 = vrot.slane %v2855_v56, %v4284_v5  ;;  %v2743_v30 = vrot.slane %v2729_v57, %v4288_v8  ;;  %v2744_v7 = vcombine.high %v2736_v0, %v2736_v0 }
 0x12d   : > { %v2750_v55 = vmul.f32 %v4826_v11, %v2736_v0  ;;  %v2776_v22 = vrot.slane %v2769_v32, %v4288_v8  ;;  %v2817_v49 = vcombine.low %v2812_v50, %v2816_v10  ;;  %v2864_v28 = vrot.slane %v2855_v56, %v4286_v6 }
 0x12e   : > { %v2908_v27 = vrot.slane %v2903_v24, %v4284_v5  ;;  %v2912_v40 = vrot.slane %v2903_v24, %v4286_v6  ;;  %v2745_v14 = vcombine.high %v2743_v30, %v2743_v30  ;;  %v2751_v17 = vmul.f32 %v4834_v43, %v2743_v30 }
 0x12f   : > { %v2752_v48 = vmul.f32 %v4838_v15, %v2744_v7  ;;  %v2754_v39 = vadd.f32 %v2750_v55, %v2706_v63  ;;  %v2777_v19 = vcombine.high %v2776_v22, %v2776_v22  ;;  %v2784_v31 = vrot.slane %v2776_v22, %v4288_v8 }
 0x130   : > { %v2824_v25 = vrot.slane %v2817_v49, %v4288_v8  ;;  %v2865_v44 = vcombine.low %v2860_v37, %v2864_v28  ;;  %v2753_v57 = vmul.f32 %v4844_v9, %v2745_v14  ;;  %v2755_v0 = vadd.f32 %v2751_v17, %v2707_v18 }
 0x131   : > { %v2756_v56 = vadd.f32 %v2752_v48, %v2708_v13  ;;  %v2913_v32 = vcombine.low %v2908_v27, %v2912_v40  ;;  %v2791_v50 = vrot.slane %v2777_v19, %v4288_v8  ;;  %v2792_v24 = vcombine.high %v2784_v31, %v2784_v31 }
 0x132   : > { %v2798_v10 = vmul.f32 %v4849_v16, %v2784_v31  ;;  %v2825_v30 = vcombine.high %v2824_v25, %v2824_v25  ;;  %v2757_v1 = vadd.f32 %v2753_v57, %v2709_v45  ;;  %v2832_v63 = vrot.slane %v2824_v25, %v4288_v8 }
 0x133   : > { %v2872_v7 = vrot.slane %v2865_v44, %v4288_v8  ;;  %v2920_v55 = vrot.slane %v2913_v32, %v4288_v8  ;;  %v2793_v22 = vcombine.high %v2791_v50, %v2791_v50  ;;  %v2799_v37 = vmul.f32 %v4856_v3, %v2791_v50 }
 0x134   : > { %v2800_v18 = vmul.f32 %v4860_v46, %v2792_v24  ;;  %v2802_v13 = vadd.f32 %v2798_v10, %v2754_v39  ;;  %v2839_v49 = vrot.slane %v2825_v30, %v4288_v8  ;;  %v2840_v28 = vcombine.high %v2832_v63, %v2832_v63  ;;  %v2947_v24 = vld [vmem:[#allocation5 + $0x71] ss:$8 sm:$0x3] }
 0x135   : > { %v2846_v27 = vmul.f32 %v4865_v58, %v2832_v63  ;;  %v2873_v40 = vcombine.high %v2872_v7, %v2872_v7  ;;  %v2801_v45 = vmul.f32 %v4869_v62, %v2793_v22  ;;  %v2803_v14 = vadd.f32 %v2799_v37, %v2755_v0 }
 0x136   : > { %v2804_v17 = vadd.f32 %v2800_v18, %v2756_v56  ;;  %v2880_v48 = vrot.slane %v2872_v7, %v4288_v8  ;;  %v2841_v19 = vcombine.high %v2839_v49, %v2839_v49  ;;  %v2847_v31 = vmul.f32 %v4874_v53, %v2839_v49 }
 0x137   : > { %v2848_v25 = vmul.f32 %v4878_v36, %v2840_v28  ;;  %v2850_v44 = vadd.f32 %v2846_v27, %v2802_v13  ;;  %v2805_v57 = vadd.f32 %v2801_v45, %v2757_v1  ;;  %v2887_v39 = vrot.slane %v2873_v40, %v4288_v8  ;;  %v2995_v28 = vld [vmem:[#allocation5 + $0x72] ss:$8 sm:$0x3] }
 0x138   : > { %v2888_v32 = vcombine.high %v2880_v48, %v2880_v48  ;;  %v2894_v50 = vmul.f32 %v4883_v12, %v2880_v48  ;;  %v2849_v10 = vmul.f32 %v4887_v47, %v2841_v19  ;;  %v2851_v30 = vadd.f32 %v2847_v31, %v2803_v14 }
 0x139   : > { %v2852_v0 = vadd.f32 %v2848_v25, %v2804_v17  ;;  %v2921_v56 = vcombine.high %v2920_v55, %v2920_v55  ;;  %v2889_v63 = vcombine.high %v2887_v39, %v2887_v39  ;;  %v2895_v7 = vmul.f32 %v4891_v21, %v2887_v39  ;;  %v3043_v17 = vld [vmem:[#allocation5 + $0x73] ss:$8 sm:$0x3]  ;;  %v3091_v25 = vld [vmem:[#allocation5 + $0x74] ss:$8 sm:$0x3] }
 0x13a   : > { %v2896_v22 = vmul.f32 %v4895_v42, %v2888_v32  ;;  %v5069_v37 = vadd.f32 %v2894_v50, %v2850_v44  ;;  %v2853_v18 = vadd.f32 %v2849_v10, %v2805_v57  ;;  %v2928_v1 = vrot.slane %v2920_v55, %v4288_v8  ;;  %v3139_v50 = vld [vmem:[#allocation5 + $0x75] ss:$8 sm:$0x3]  ;;  %v5086_v10 = vld [vmem:[#allocation5 + $0x76] ss:$8 sm:$0x3] }
 0x13b   : > { %v2935_v13 = vrot.slane %v2921_v56, %v4288_v8  ;;  %v2952_v49 = vrot.slane %v2947_v24, %v4284_v5  ;;  %v2897_v27 = vmul.f32 %v4904_v54, %v2889_v63  ;;  %v5075_v40 = vadd.f32 %v2895_v7, %v2851_v30 }
 0x13c   : > { %v5077_v45 = vadd.f32 %v2896_v22, %v2852_v0  ;;  %v2956_v14 = vrot.slane %v2947_v24, %v4286_v6  ;;  %v2936_v48 = vcombine.high %v2928_v1, %v2928_v1  ;;  %v2942_v31 = vmul.f32 %v4744_v60, %v2928_v1  ;;  %v5095_v22 = vld [vmem:[#allocation5 + $0x77] ss:$8 sm:$0x3] }
 0x13d   : > { %v2937_v19 = vcombine.high %v2935_v13, %v2935_v13  ;;  %v2943_v55 = vmul.f32 %v4752_v52, %v2935_v13  ;;  %v5082_v44 = vadd.f32 %v2897_v27, %v2853_v18  ;;  %v3000_v39 = vrot.slane %v2995_v28, %v4284_v5 }
 0x13e   : > { %v2957_v57 = vcombine.low %v2952_v49, %v2956_v14  ;;  %v3004_v32 = vrot.slane %v2995_v28, %v4286_v6  ;;  %v2944_v24 = vmul.f32 %v4756_v2, %v2936_v48  ;;  %v3048_v0 = vrot.slane %v3043_v17, %v4284_v5 }
 0x13f   : > { %5586 = vst [vmem:[#allocation27_spill] sm:$0xff] %v5082_v44  ;;  %v2945_v30 = vmul.f32 %v5583_v59, %v2937_v19  ;;  %v3052_v60 = vrot.slane %v3043_v17, %v4286_v6  ;;  %v3096_v63 = vrot.slane %v3091_v25, %v4284_v5  ;;  %v3100_v7 = vrot.slane %v3091_v25, %v4286_v6 }
 0x140   : > { %v2964_v52 = vrot.slane %v2957_v57, %v4288_v8  ;;  %v3005_v56 = vcombine.low %v3000_v39, %v3004_v32  ;;  %v3144_v1 = vrot.slane %v3139_v50, %v4284_v5  ;;  %v3148_v2 = vrot.slane %v3139_v50, %v4286_v6 }
 0x141   : > { %v3053_v18 = vcombine.low %v3048_v0, %v3052_v60  ;;  %v3192_v59 = vrot.slane %v5086_v10, %v4284_v5  ;;  %v3101_v27 = vcombine.low %v3096_v63, %v3100_v7  ;;  %v3196_v48 = vrot.slane %v5086_v10, %v4286_v6 }
 0x142   : > { %v2965_v13 = vcombine.high %v2964_v52, %v2964_v52  ;;  %v2972_v49 = vrot.slane %v2964_v52, %v4288_v8  ;;  %v3012_v28 = vrot.slane %v3005_v56, %v4288_v8  ;;  %v3149_v17 = vcombine.low %v3144_v1, %v3148_v2 }
 0x143   : > { %v3060_v14 = vrot.slane %v3053_v18, %v4288_v8  ;;  %v3240_v19 = vrot.slane %v5095_v22, %v4284_v5  ;;  %v3108_v52 = vrot.slane %v3101_v27, %v4288_v8 }
 0x144   : > { %v2979_v25 = vrot.slane %v2965_v13, %v4288_v8  ;;  %v2980_v57 = vcombine.high %v2972_v49, %v2972_v49  ;;  %v2986_v39 = vmul.f32 %v5582_v61, %v2972_v49  ;;  %v3013_v32 = vcombine.high %v3012_v28, %v3012_v28 }
 0x145   : > { %v3020_v50 = vrot.slane %v3012_v28, %v4288_v8  ;;  %v3061_v0 = vcombine.high %v3060_v14, %v3060_v14  ;;  %v3068_v60 = vrot.slane %v3060_v14, %v4288_v8 }
 0x146   : > { %v2981_v56 = vcombine.high %v2979_v25, %v2979_v25  ;;  %v2987_v63 = vmul.f32 %v5584_v34, %v2979_v25  ;;  %v2988_v10 = vmul.f32 %v4775_v4, %v2980_v57  ;;  %v2990_v7 = vadd.f32 %v2986_v39, %v2942_v31 }
 0x147   : > { %v3027_v18 = vrot.slane %v3013_v32, %v4288_v8  ;;  %v3028_v1 = vcombine.high %v3020_v50, %v3020_v50  ;;  %v3034_v2 = vmul.f32 %v5585_v41, %v3020_v50  ;;  %v3075_v61 = vrot.slane %v3061_v0, %v4288_v8 }
 0x148   : > { %v2989_v13 = vmul.f32 %v4780_v20, %v2981_v56  ;;  %v2991_v49 = vadd.f32 %v2987_v63, %v2943_v55  ;;  %v2992_v28 = vadd.f32 %v2988_v10, %v2944_v24  ;;  %v3076_v14 = vcombine.high %v3068_v60, %v3068_v60 }
 0x149   : > { %v3029_v44 = vcombine.high %v3027_v18, %v3027_v18  ;;  %v3035_v27 = vmul.f32 %v4788_v23, %v3027_v18  ;;  %v3036_v34 = vmul.f32 %v4792_v38, %v3028_v1  ;;  %v3038_v25 = vadd.f32 %v3034_v2, %v2990_v7 }
 0x14a   : > { %v2993_v4 = vadd.f32 %v2989_v13, %v2945_v30  ;;  %v3077_v31 = vcombine.high %v3075_v61, %v3075_v61  ;;  %v3082_v57 = vmul.f32 %v4802_v33, %v3068_v60  ;;  %v3083_v39 = vmul.f32 %v4806_v29, %v3075_v61 }
 0x14b   : > { %v3037_v41 = vmul.f32 %v4798_v35, %v3029_v44  ;;  %v3039_v32 = vadd.f32 %v3035_v27, %v2991_v49  ;;  %v3040_v50 = vadd.f32 %v3036_v34, %v2992_v28  ;;  %v3084_v20 = vmul.f32 %v4813_v51, %v3076_v14 }
 0x14c   : > { %v3085_v55 = vmul.f32 %v4817_v26, %v3077_v31  ;;  %v3086_v24 = vadd.f32 %v3082_v57, %v3038_v25  ;;  %v3109_v0 = vcombine.high %v3108_v52, %v3108_v52  ;;  %v3116_v23 = vrot.slane %v3108_v52, %v4288_v8 }
 0x14d   : > { %v3041_v38 = vadd.f32 %v3037_v41, %v2993_v4  ;;  %v3087_v56 = vadd.f32 %v3083_v39, %v3039_v32  ;;  %v3088_v30 = vadd.f32 %v3084_v20, %v3040_v50  ;;  %v3156_v63 = vrot.slane %v3149_v17, %v4288_v8  ;;  %v5588_v20 = vld [vmem:[#allocation15_spill] sm:$0xff] }
 0x14e   : > { %v3123_v33 = vrot.slane %v3109_v0, %v4288_v8  ;;  %v3124_v29 = vcombine.high %v3116_v23, %v3116_v23  ;;  %v3130_v35 = vmul.f32 %v4826_v11, %v3116_v23  ;;  %v3197_v44 = vcombine.low %v3192_v59, %v3196_v48 }
 0x14f   : > { %v3089_v60 = vadd.f32 %v3085_v55, %v3041_v38  ;;  %v3157_v10 = vcombine.high %v3156_v63, %v3156_v63  ;;  %v3164_v51 = vrot.slane %v3156_v63, %v4288_v8  ;;  %v3244_v26 = vrot.slane %v5095_v22, %v4286_v6 }
 0x150   : > { %v3125_v7 = vcombine.high %v3123_v33, %v3123_v33  ;;  %v3131_v52 = vmul.f32 %v4834_v43, %v3123_v33  ;;  %v3132_v18 = vmul.f32 %v4838_v15, %v3124_v29  ;;  %v3134_v1 = vadd.f32 %v3130_v35, %v3086_v24  ;;  %v5589_v35 = vld [vmem:[#allocation16_spill] sm:$0xff] }
 0x151   : > { %v3171_v17 = vrot.slane %v3157_v10, %v4288_v8  ;;  %v3172_v2 = vcombine.high %v3164_v51, %v3164_v51  ;;  %v3178_v61 = vmul.f32 %v4849_v16, %v3164_v51  ;;  %v3204_v11 = vrot.slane %v3197_v44, %v4288_v8  ;;  %v5590_v51 = vld [vmem:[#allocation17_spill] sm:$0xff] }
 0x152   : > { %v3133_v59 = vmul.f32 %v4844_v9, %v3125_v7  ;;  %v3135_v48 = vadd.f32 %v3131_v52, %v3087_v56  ;;  %v3136_v13 = vadd.f32 %v3132_v18, %v3088_v30  ;;  %v3245_v49 = vcombine.low %v3240_v19, %v3244_v26  ;;  %v5587_v9 = vld [vmem:[#allocation14_spill] sm:$0xff] }
 0x153   : > { %v3173_v28 = vcombine.high %v3171_v17, %v3171_v17  ;;  %v3179_v22 = vmul.f32 %v4856_v3, %v3171_v17  ;;  %v3180_v43 = vmul.f32 %v4860_v46, %v3172_v2  ;;  %v3182_v14 = vadd.f32 %v3178_v61, %v3134_v1  ;;  %v5592_v17 = vld [vmem:[#allocation19_spill] sm:$0xff] }
 0x154   : > { %v3137_v15 = vadd.f32 %v3133_v59, %v3089_v60  ;;  %v3205_v27 = vcombine.high %v3204_v11, %v3204_v11  ;;  %v3212_v34 = vrot.slane %v3204_v11, %v4288_v8  ;;  %v3252_v25 = vrot.slane %v3245_v49, %v4288_v8  ;;  %v5593_v11 = vld [vmem:[#allocation20_spill] sm:$0xff] }
 0x155   : > { %v3181_v16 = vmul.f32 %v4869_v62, %v3173_v28  ;;  %v3183_v4 = vadd.f32 %v3179_v22, %v3135_v48  ;;  %v3184_v31 = vadd.f32 %v3180_v43, %v3136_v13  ;;  %v3289_v57 = vrot.slane %v5587_v9, %v4284_v5  ;;  %v5594_v13 = vld [vmem:[#allocation21_spill] sm:$0xff]  ;;  %v5595_v22 = vld [vmem:[#allocation12_spill] sm:$0xff] }
 0x156   : > { %v3219_v19 = vrot.slane %v3205_v27, %v4288_v8  ;;  %v3220_v39 = vcombine.high %v3212_v34, %v3212_v34  ;;  %v3226_v3 = vmul.f32 %v4865_v58, %v3212_v34  ;;  %v3253_v46 = vcombine.high %v3252_v25, %v3252_v25 }
 0x157   : > { %v3185_v41 = vadd.f32 %v3181_v16, %v3137_v15  ;;  %v3260_v32 = vrot.slane %v3252_v25, %v4288_v8  ;;  %v3293_v50 = vrot.slane %v5587_v9, %v4286_v6  ;;  %v3297_v62 = vrot.slane %v5588_v20, %v4284_v5  ;;  %v5596_v15 = vld [vmem:[#allocation13_spill] sm:$0xff]  ;;  %v5597_v25 = vld [vmem:[#allocation22_spill] sm:$0xff] }
 0x158   : > { %v3221_v55 = vcombine.high %v3219_v19, %v3219_v19  ;;  %v3227_v24 = vmul.f32 %v4874_v53, %v3219_v19  ;;  %v3228_v0 = vmul.f32 %v4878_v36, %v3220_v39  ;;  %v3230_v23 = vadd.f32 %v3226_v3, %v3182_v14  ;;  %v5599_v3 = vld [vmem:[#allocation11_spill] sm:$0xff] }
 0x159   : > { %v3267_v38 = vrot.slane %v3253_v46, %v4288_v8  ;;  %v3268_v56 = vcombine.high %v3260_v32, %v3260_v32  ;;  %v3274_v58 = vmul.f32 %v4883_v12, %v3260_v32  ;;  %v3301_v30 = vrot.slane %v5588_v20, %v4286_v6  ;;  %v5600_v32 = vld [vmem:[#allocation24_spill] sm:$0xff] }
 0x15a   : > { %v3229_v63 = vmul.f32 %v4887_v47, %v3221_v55  ;;  %v3231_v33 = vadd.f32 %v3227_v24, %v3183_v4  ;;  %v3232_v29 = vadd.f32 %v3228_v0, %v3184_v31  ;;  %v3305_v44 = vrot.slane %v5589_v35, %v4284_v5  ;;  %v5598_v31 = vld [vmem:[#allocation23_spill] sm:$0xff]  ;;  %v5601_v0 = vld [vmem:[#allocation25_spill] sm:$0xff] }
 0x15b   : > { %v3269_v60 = vcombine.high %v3267_v38, %v3267_v38  ;;  %v3275_v53 = vmul.f32 %v4891_v21, %v3267_v38  ;;  %v3276_v36 = vmul.f32 %v4895_v42, %v3268_v56  ;;  %v5164_v10 = vadd.f32 %v3274_v58, %v3230_v23  ;;  %v5591_v21 = vld [vmem:[#allocation18_spill] sm:$0xff] }
 0x15c   : > { %v3233_v8 = vadd.f32 %v3229_v63, %v3185_v41  ;;  %v3309_v12 = vrot.slane %v5589_v35, %v4286_v6  ;;  %v3313_v26 = vrot.slane %v5590_v51, %v4284_v5  ;;  %v3333_v42 = vrot.slane %v5591_v21, %v4284_v5  ;;  %v5602_v56 = vld [vmem:[#allocation26_spill] sm:$0xff] }
 0x15d   : > { %v3277_v7 = vmul.f32 %v4904_v54, %v3269_v60  ;;  %v5173_v52 = vadd.f32 %v3275_v53, %v3231_v33  ;;  %v5175_v18 = vadd.f32 %v3276_v36, %v3232_v29  ;;  %v3337_v1 = vrot.slane %v5591_v21, %v4286_v6  ;;  %v5603_v33 = vld [vmem:[#allocation31_spill] sm:$0xff]  ;;  %v5604_v53 = vld [vmem:[#allocation32_spill] sm:$0xff] }
 0x15e   : > { %v3341_v2 = vrot.slane %v5592_v17, %v4284_v5  ;;  %v3345_v61 = vrot.slane %v5592_v17, %v4286_v6  ;;  %v3349_v59 = vrot.slane %v5593_v11, %v4284_v5  ;;  %v3353_v48 = vrot.slane %v5593_v11, %v4286_v6  ;;  %v5606_v11 = vld [vmem:[#allocation34_spill] sm:$0xff] }
 0x15f   : > { %v5187_v54 = vadd.f32 %v3277_v7, %v3233_v8  ;;  %v3357_v49 = vrot.slane %v5594_v13, %v4284_v5  ;;  %v3361_v28 = vrot.slane %v5594_v13, %v4286_v6  ;;  %v3377_v43 = vrot.slane %v5595_v22, %v4284_v5  ;;  %v5605_v7 = vld [vmem:[#allocation33_spill] sm:$0xff] }
 0x160   : > { %v3381_v14 = vrot.slane %v5595_v22, %v4286_v6  ;;  %v3385_v27 = vrot.slane %v5596_v15, %v4284_v5  ;;  %v3389_v34 = vrot.slane %v5596_v15, %v4286_v6  ;;  %v3393_v16 = vrot.slane %v5597_v25, %v4284_v5  ;;  %v5607_v15 = vld [vmem:[#allocation35_spill] sm:$0xff] }
 0x161   : > { %v3397_v4 = vrot.slane %v5597_v25, %v4286_v6  ;;  %v3401_v19 = vrot.slane %v5598_v31, %v4284_v5  ;;  %v3405_v39 = vrot.slane %v5598_v31, %v4286_v6  ;;  %v3421_v46 = vrot.slane %v5599_v3, %v4284_v5  ;;  %v5611_v25 = vld [vmem:[#allocation27_spill] sm:$0xff] }
 0x162   : > { %v3425_v41 = vrot.slane %v5599_v3, %v4286_v6  ;;  %v3429_v55 = vrot.slane %v5600_v32, %v4284_v5  ;;  %v3433_v24 = vrot.slane %v5600_v32, %v4286_v6  ;;  %v3437_v23 = vrot.slane %v5601_v0, %v4284_v5  ;;  %v5608_v3 = vld [vmem:[#allocation36_spill] sm:$0xff] }
 0x163   : > { %v3441_v38 = vrot.slane %v5601_v0, %v4286_v6  ;;  %v3445_v58 = vrot.slane %v5602_v56, %v4284_v5  ;;  %v3449_v63 = vrot.slane %v5602_v56, %v4286_v6  ;;  %v3465_v29 = vrot.slane %v5603_v33, %v4284_v5  ;;  %v5609_v56 = vld [vmem:[#allocation37_spill] sm:$0xff] }
 0x164   : > { %v3469_v60 = vrot.slane %v5603_v33, %v4286_v6  ;;  %v3473_v36 = vrot.slane %v5604_v53, %v4284_v5  ;;  %v3477_v8 = vrot.slane %v5604_v53, %v4286_v6  ;;  %v3481_v21 = vrot.slane %v5605_v7, %v4284_v5 }
 0x165   : > { %v3485_v17 = vrot.slane %v5605_v7, %v4286_v6  ;;  %v3489_v13 = vrot.slane %v5606_v11, %v4284_v5  ;;  %v3493_v22 = vrot.slane %v5606_v11, %v4286_v6  ;;  %v5610_v7 = vld [vmem:[#allocation38_spill] sm:$0xff]  ;;  %v3601_v0 = vrot.slane %v5164_v10, %v4286_v6 }
 0x166   : > { %v3605_v33 = vrot.slane %v5173_v52, %v4284_v5  ;;  %v3635_v53 = vsel %vm3634_vm0, %v3289_v57, %v3333_v42  ;;  %v3636_v11 = vsel %vm3634_vm0, %v3293_v50, %v3337_v1  ;;  %v3637_v47 = vsel %vm3634_vm0, %v3297_v62, %v3341_v2 }
 0x167   : > { %v3638_v32 = vsel %vm3634_vm0, %v3301_v30, %v3345_v61  ;;  %v3639_v31 = vsel %vm3634_vm0, %v3305_v44, %v3349_v59  ;;  %v3640_v57 = vsel %vm3634_vm0, %v3309_v12, %v3353_v48  ;;  %v3641_v9 = vsel %vm3634_vm0, %v3313_v26, %v3357_v49 }
 0x168   : > { %v5612_v50 = vrot.slane %v5590_v51, %v4286_v6  ;;  %v3644_v42 = vsel %vm3643_vm1, %v3635_v53, %v3377_v43  ;;  %v3645_v20 = vsel %vm3643_vm1, %v3636_v11, %v3381_v14  ;;  %v3646_v30 = vsel %vm3643_vm1, %v3637_v47, %v3385_v27 }
 0x169   : > { %v3647_v44 = vsel %vm3643_vm1, %v3638_v32, %v3389_v34  ;;  %v3648_v1 = vsel %vm3643_vm1, %v3639_v31, %v3393_v16  ;;  %v3649_v35 = vsel %vm3643_vm1, %v3640_v57, %v3397_v4  ;;  %v3650_v12 = vsel %vm3643_vm1, %v3641_v9, %v3401_v19 }
 0x16a   : > { %v3642_v62 = vsel %vm3634_vm0, %v5612_v50, %v3361_v28  ;;  %v3653_v2 = vsel %vm3652_vm2, %v3644_v42, %v3421_v46  ;;  %v3654_v51 = vsel %vm3652_vm2, %v3645_v20, %v3425_v41  ;;  %v3655_v61 = vsel %vm3652_vm2, %v3646_v30, %v3429_v55 }
 0x16b   : > { %v3651_v26 = vsel %vm3643_vm1, %v3642_v62, %v3405_v39  ;;  %v3656_v59 = vsel %vm3652_vm2, %v3647_v44, %v3433_v24  ;;  %v3657_v47 = vsel %vm3652_vm2, %v3648_v1, %v3437_v23  ;;  %v3658_v48 = vsel %vm3652_vm2, %v3649_v35, %v3441_v38 }
 0x16c   : > { %v3659_v49 = vsel %vm3652_vm2, %v3650_v12, %v3445_v58  ;;  %v3660_v28 = vsel %vm3652_vm2, %v3651_v26, %v3449_v63  ;;  %v3662_v43 = vsel %vm3661_vm3, %v3653_v2, %v3465_v29  ;;  %v3663_v14 = vsel %vm3661_vm3, %v3654_v51, %v3469_v60 }
 0x16d   : > { %v3664_v27 = vsel %vm3661_vm3, %v3655_v61, %v3473_v36  ;;  %v3665_v34 = vsel %vm3661_vm3, %v3656_v59, %v3477_v8  ;;  %v3666_v16 = vsel %vm3661_vm3, %v3657_v47, %v3481_v21  ;;  %v3667_v4 = vsel %vm3661_vm3, %v3658_v48, %v3485_v17 }
 0x16e   : > { %v3668_v19 = vsel %vm3661_vm3, %v3659_v49, %v3489_v13  ;;  %v3669_v39 = vsel %vm3661_vm3, %v3660_v28, %v3493_v22  ;;  %v5613_v46 = vrot.slane %v5607_v15, %v4284_v5  ;;  %v5614_v55 = vrot.slane %v5607_v15, %v4286_v6 }
 0x16f   : > { %v5615_v23 = vrot.slane %v5608_v3, %v4284_v5  ;;  %v5616_v58 = vrot.slane %v5608_v3, %v4286_v6  ;;  %v5617_v29 = vrot.slane %v5609_v56, %v4284_v5  ;;  %v5618_v36 = vrot.slane %v5609_v56, %v4286_v6 }
 0x170   : > { %v3671_v41 = vsel %vm3670_vm4, %v3662_v43, %v5613_v46  ;;  %v3672_v24 = vsel %vm3670_vm4, %v3663_v14, %v5614_v55  ;;  %v5619_v21 = vrot.slane %v5610_v7, %v4284_v5  ;;  %v5620_v13 = vrot.slane %v5610_v7, %v4286_v6 }
 0x171   : > { %v3673_v38 = vsel %vm3670_vm4, %v3664_v27, %v5615_v23  ;;  %v3674_v63 = vsel %vm3670_vm4, %v3665_v34, %v5616_v58  ;;  %v3675_v60 = vsel %vm3670_vm4, %v3666_v16, %v5617_v29  ;;  %v3676_v8 = vsel %vm3670_vm4, %v3667_v4, %v5618_v36 }
 0x172   : > { %v3677_v17 = vsel %vm3670_vm4, %v3668_v19, %v5619_v21  ;;  %v3678_v22 = vsel %vm3670_vm4, %v3669_v39, %v5620_v13  ;;  %v5621_v15 = vrot.slane %v5069_v37, %v4284_v5  ;;  %v5622_v3 = vrot.slane %v5069_v37, %v4286_v6 }
 0x173   : > { %v5623_v56 = vrot.slane %v5075_v40, %v4284_v5  ;;  %v5624_v11 = vrot.slane %v5075_v40, %v4286_v6  ;;  %v5625_v57 = vrot.slane %v5077_v45, %v4284_v5  ;;  %v5626_v37 = vrot.slane %v5077_v45, %v4286_v6 }
 0x174   : > { %v3680_v31 = vsel %vm3679_vm5, %v3671_v41, %v5621_v15  ;;  %v3681_v32 = vsel %vm3679_vm5, %v3672_v24, %v5622_v3  ;;  %v5627_v62 = vrot.slane %v5611_v25, %v4284_v5  ;;  %v5628_v42 = vrot.slane %v5611_v25, %v4286_v6 }
 0x175   : > { %v3682_v53 = vsel %vm3679_vm5, %v3673_v38, %v5623_v56  ;;  %v3683_v7 = vsel %vm3679_vm5, %v3674_v63, %v5624_v11  ;;  %v3684_v9 = vsel %vm3679_vm5, %v3675_v60, %v5625_v57  ;;  %v3685_v50 = vsel %vm3679_vm5, %v3676_v8, %v5626_v37 }
 0x176   : > { %v3686_v40 = vsel %vm3679_vm5, %v3677_v17, %v5627_v62  ;;  %v3687_v20 = vsel %vm3679_vm5, %v3678_v22, %v5628_v42  ;;  %v5629_v45 = vrot.slane %v5164_v10, %v4284_v5  ;;  %v3690_v25 = vsel %vm3688_vm6, %v3681_v32, %v3601_v0 }
 0x177   : > { %v3691_v44 = vsel %vm3688_vm6, %v3682_v53, %v3605_v33  ;;  %v5630_v1 = vrot.slane %v5173_v52, %v4286_v6  ;;  %v5631_v12 = vrot.slane %v5175_v18, %v4284_v5  ;;  %v5632_v0 = vrot.slane %v5175_v18, %v4286_v6  ;;  %3699 = vst.msk [vmem:[%s5354_s17 + $0x8] sm:$0xff] %vm3698_vm7, %v3690_v25 }
 0x178   : > { %v3689_v30 = vsel %vm3688_vm6, %v3680_v31, %v5629_v45  ;;  %v5633_v33 = vrot.slane %v5187_v54, %v4284_v5  ;;  %v5634_v52 = vrot.slane %v5187_v54, %v4286_v6  ;;  %3700 = vst [vmem:[%s5354_s17 + $0x10] sm:$0xff] %v3691_v44 }
 0x179   : > { %v3692_v35 = vsel %vm3688_vm6, %v3683_v7, %v5630_v1  ;;  %v3693_v10 = vsel %vm3688_vm6, %v3684_v9, %v5631_v12  ;;  %v3694_v26 = vsel %vm3688_vm6, %v3685_v50, %v5632_v0  ;;  %3697 = vst [vmem:[%s5354_s17] sm:$0xff] %v3689_v30 }
 0x17a   : > { %v3695_v2 = vsel %vm3688_vm6, %v3686_v40, %v5633_v33  ;;  %v3696_v51 = vsel %vm3688_vm6, %v3687_v20, %v5634_v52  ;;  %3701 = vst.msk [vmem:[%s5354_s17 + $0x18] sm:$0xff] %vm3698_vm7, %v3692_v35  ;;  %3702 = vst [vmem:[%s5354_s17 + $0x20] sm:$0xff] %v3693_v10 }
 0x17b   : > { %3704 = vst [vmem:[%s5354_s17 + $0x30] sm:$0xff] %v3695_v2  ;;  %3703 = vst.msk [vmem:[%s5354_s17 + $0x28] sm:$0xff] %vm3698_vm7, %v3694_v26 }
 0x17c   : > { %3705 = vst.msk [vmem:[%s5354_s17 + $0x38] sm:$0xff] %vm3698_vm7, %v3696_v51 }
 0x17d   : > { %4067 = shalt.err (!%p4064_p0)
}
 0x17e   : > { %s4068_s4 = scalar_lea.hbm %s5404_s8, 1024  ;;  %s4072_s6 = scalar_lea.hbm %s5494_s2, 4096 }
 0x17f   : > { %p4069_p5 = scmp.ne.s32.totalorder %s5404_s8, %s4068_s4  ;;  %p4073_p4 = scmp.lt.s32.totalorder %s5404_s8, %s5494_s2 }
 0x180   : > { %p4074_p6 = scmp.lt.s32.totalorder %s4072_s6, %s4068_s4 }
 0x181   : > { %p4070_p2 = pnand %p4069_p5, %p5635_p10 }
 0x182   : > { %p4075_p8 = por %p4074_p6, %p4073_p4 }
 0x183   : > { %p4071_p1 = pneg %p4070_p2 }
 0x185   : > { %p4076_p3 = pnand %p4075_p8, %p4071_p1 }
 0x187   : > { %4079 = shalt.err (!%p4076_p3)
}
 0x188   : > { %s4130_s23 = smov 256   ;;  %s4131_s19 = smov 16  }
 0x189   : > { %3912 = dma.vmem_to_hbm [thread:$0]  (%p5635_p10), %s5406_s25, 1024, %s5404_s8, %s3707_s18, %s4130_s23, %s4130_s23, %s4131_s19  }
 0x18a PF: > { %p3929_p7 = scmp.ge.s32.totalorder %s4122_s12, 2  ;;  %s3736_s15 = sand.u32 1, %s4110_s9  }
 0x18b   : > { %p5636_p9 = scmp.ne.s32.totalorder %s5538_s16, 0  ;;  %s3737_s17 = scalar_lea.sflag [#allocation4], %s3736_s15 }
 0x18d   : > { %p3923_p11 = pnand %p3929_p7, %p5636_p9 }
 0x18f   : > { %p3924_p12 = pneg %p3923_p11 }
 0x191   : > { %4105 = dma.done.wait (%p3924_p12), %s3737_s17, 1024  }
 0x192   : > { %4107 = vsyncadd (%p3924_p12), %s3737_s17, 4294966272  ;;  %p16_p13 = scmp.ge.s32.totalorder %s4200_s21, 6   ;;  %s5637_s9 = smov %s4114_s10 }
 0x193   : > { %s5638_s10 = smov %s4118_s11  ;;  %s5639_s11 = smov %s4220_s29 }
 0x194   : > { %s5640_s12 = smov %s4200_s21  ;;  %18 = sbr.rel (!%p16_p13) target bundleno = 6 (0x6), region = 171 }
 0x199   :  { %3742 = vsyncpa [#allocation3], 1 }
 0x19a   :  { %3744 = vsyncpa [#allocation3 + $0x1], 1 }
 0x19b   :  { %3745 = vsyncpa [#allocation6], 1 }
 0x19c   :  { %3746 = vsyncpa [#allocation4], 1 }
 0x19d   :  { %3748 = vsyncpa [#allocation4 + $0x1], 1 }

</bundles_post_ra>
